<compile_context>
chip_gen: v5e
topology: v5e:2x2
jax: 0.10.0
libtpu: 0.0.40
codegen_flags: <defaults>
</compile_context>

<pallas_src>
from functools import partial

import jax
import jax.numpy as jnp
from jax.experimental import pallas as pl
from jax.experimental.pallas import tpu as pltpu

INPUT_DIM = 5
HIDDEN = 64
LANES = 128  # padded lane width for the fc output path


# ------------------------------------------------------------------ kernel ---

def _fused_lstm_kernel(
    # inputs
    x_ref,                    # (TC, B, 5)           this chunk's raw inputs
    hid0_ref,                 # (3, 2, B, H)         initial (h, c) per layer
    w1_ref, b1_ref,           # (2H, 4H) bf16, (1, 4H) f32    fused [W_ih.T ; W_hh.T]
    w2_ref, b2_ref,
    w3_ref, b3_ref,
    wfc_ref, bfc_ref,         # (H, 128) bf16, (1, 128) f32   fc1 padded to 128 lanes
    # outputs
    out_ref,                  # (1, TC, 128)         per-chunk fc outputs (lane-dense)
    hid_out_ref,              # (3, 2, B, H)         final (h, c) per layer
    # scratch (persist across the whole grid)
    xh_scr,                   # VMEM (3, B, 2H) f32  per-layer matmul LHS [input | h]
    c_scr,                    # VMEM (3, B, H)  f32  per-layer cell state
    h3_scr,                   # VMEM (TC, H)    f32  h3[B-1] rows for the deferred FC
    *, valid_len, padded_len,
):
    TC, B, _ = x_ref.shape
    chunk = pl.program_id(0)
    needs_mask = padded_len != valid_len          # trace-time constant

    @pl.when(chunk == 0)
    def _init():
        # zeros matter for lanes [5:64) of layer-1's input half (never written again)
        xh_scr[...] = jnp.zeros_like(xh_scr)
        for l in range(3):
            xh_scr[l, :, HIDDEN:2 * HIDDEN] = hid0_ref[l, 0]
            c_scr[l] = hid0_ref[l, 1]

    layer_params = ((w1_ref, b1_ref), (w2_ref, b2_ref), (w3_ref, b3_ref))

    for s in range(TC):                           # fully unrolled (TC is small)
        # raw (B, 5) features -> lanes [0:5) of layer-1's LHS (no HBM-side padding)
        xh_scr[0, :, 0:INPUT_DIM] = x_ref[s]
        valid = (chunk * TC + s) < valid_len if needs_mask else None

        h_new = None
        for layer, (w_ref, b_ref) in enumerate(layer_params):
            # single fused gate matmul on the pre-laid-out [input | h] operand (bf16 MXU)
            gates = (jnp.dot(xh_scr[layer].astype(jnp.bfloat16), w_ref[...],
                             preferred_element_type=jnp.float32)
                     + b_ref[...])                                  # (B, 4H) f32
            sg = jax.nn.sigmoid(gates)            # vreg-wise on the full gate tensor
            i_g = sg[:, 0 * HIDDEN:1 * HIDDEN]
            f_g = sg[:, 1 * HIDDEN:2 * HIDDEN]
            o_g = sg[:, 3 * HIDDEN:4 * HIDDEN]
            g_g = jnp.tanh(gates[:, 2 * HIDDEN:3 * HIDDEN])
            c_old = c_scr[layer]
            c_new = f_g * c_old + i_g * g_g
            h_new = o_g * jnp.tanh(c_new)
            if needs_mask:                        # freeze state on padded tail steps
                c_new = jnp.where(valid, c_new, c_old)
                h_new = jnp.where(valid, h_new, xh_scr[layer, :, HIDDEN:2 * HIDDEN])
            c_scr[layer] = c_new
            xh_scr[layer, :, HIDDEN:2 * HIDDEN] = h_new             # h state for t+1
            if layer < 2:
                xh_scr[layer + 1, :, 0:HIDDEN] = h_new              # input to next layer

        h3_scr[s:s + 1, :] = h_new[B - 1:B, :]    # only row B-1 feeds fc1

    # deferred FC head: ONE (TC, H) @ (H, 128) matmul per chunk, lane-dense store.
    out_ref[0] = (jnp.dot(h3_scr[...].astype(jnp.bfloat16), wfc_ref[...],
                          preferred_element_type=jnp.float32) + bfc_ref[...])

    @pl.when(chunk == pl.num_programs(0) - 1)
    def _final():
        for l in range(3):
            hid_out_ref[l, 0] = xh_scr[l, :, HIDDEN:2 * HIDDEN]
            hid_out_ref[l, 1] = c_scr[l]


# ----------------------------------------------------------------- wrapper ---

@partial(jax.jit, static_argnames=("time_chunk",))
def lstm_regressor_forward_seq(xs, hidden, kparams, time_chunk=8):
    """xs: (T, B, 5) f32.  hidden: [(h, c)] * 3, each (B, 64) f32.
    Applies the module forward T times inside ONE pallas_call.
    Returns (outs (T, 5) f32, final hidden list)."""
    T, B, _ = xs.shape
    TC = max(1, min(time_chunk, T))
    num_chunks = -(-T // TC)
    T_pad = num_chunks * TC
    if T_pad != T:
        xs = jnp.pad(xs, ((0, T_pad - T), (0, 0), (0, 0)))          # tiny, raw 5 lanes only

    (h1, c1), (h2, c2), (h3, c3) = hidden
    hid0 = jnp.stack([jnp.stack([h1, c1]),
                      jnp.stack([h2, c2]),
                      jnp.stack([h3, c3])])                          # (3, 2, B, H)

    const2 = lambda t: (0, 0)
    const4 = lambda t: (0, 0, 0, 0)

    in_specs = [
        pl.BlockSpec((TC, B, INPUT_DIM), lambda t: (t, 0, 0)),       # xs   (streamed per chunk)
        pl.BlockSpec((3, 2, B, HIDDEN), const4),                     # hid0 (resident)
        pl.BlockSpec((2 * HIDDEN, 4 * HIDDEN), const2),              # w1   (resident, bf16)
        pl.BlockSpec((1, 4 * HIDDEN), const2),                       # b1
        pl.BlockSpec((2 * HIDDEN, 4 * HIDDEN), const2),              # w2
        pl.BlockSpec((1, 4 * HIDDEN), const2),                       # b2
        pl.BlockSpec((2 * HIDDEN, 4 * HIDDEN), const2),              # w3
        pl.BlockSpec((1, 4 * HIDDEN), const2),                       # b3
        pl.BlockSpec((HIDDEN, LANES), const2),                       # fc_w (padded, bf16)
        pl.BlockSpec((1, LANES), const2),                            # fc_b (padded)
    ]
    out_specs = (
        pl.BlockSpec((1, TC, LANES), lambda t: (t, 0, 0)),           # per-chunk fc output
        pl.BlockSpec((3, 2, B, HIDDEN), const4),                     # final hidden (resident)
    )
    out_shapes = (
        jax.ShapeDtypeStruct((num_chunks, TC, LANES), jnp.float32),
        jax.ShapeDtypeStruct((3, 2, B, HIDDEN), jnp.float32),
    )

    kernel = partial(_fused_lstm_kernel, valid_len=T, padded_len=T_pad)
    outs, hid_final = pl.pallas_call(
        kernel,
        out_shape=out_shapes,
        grid=(num_chunks,),
        in_specs=in_specs,
        out_specs=out_specs,
        scratch_shapes=[
            pltpu.VMEM((3, B, 2 * HIDDEN), jnp.float32),             # [input | h] per layer
            pltpu.VMEM((3, B, HIDDEN), jnp.float32),                 # cell state per layer
            pltpu.VMEM((TC, HIDDEN), jnp.float32),                   # h3[B-1] rows per chunk
        ],
        input_output_aliases={1: 1},                                 # hid0 <-> final hidden
        compiler_params=pltpu.CompilerParams(
            dimension_semantics=("arbitrary",)),                     # sequential recurrence
    )(xs, hid0,
      kparams["l1_w"], kparams["l1_b"],
      kparams["l2_w"], kparams["l2_b"],
      kparams["l3_w"], kparams["l3_b"],
      kparams["fc_w"], kparams["fc_b"])

    out_seq = outs.reshape(T_pad, LANES)[:T, :INPUT_DIM]             # fc1(h_t3[-1]) per step
    new_hidden = [(hid_final[l, 0], hid_final[l, 1]) for l in range(3)]
    return out_seq, new_hidden


def lstm_regressor_forward(x, hidden, kparams):
    """Single step — exactly the PyTorch module forward: (fc1(h_t3[-1]) (5,), hidden list)."""
    out_seq, new_hidden = lstm_regressor_forward_seq(x[None], hidden, kparams, time_chunk=1)
    return out_seq[0], new_hidden


# ------------------------------------------------------------------ params ---

def make_params(key):
    """PyTorch-layout params: W_ih.T (Din,4H), W_hh.T (H,4H), combined bias, fc1.weight.T."""
    k = 1.0 / jnp.sqrt(jnp.float32(HIDDEN))
    keys = jax.random.split(key, 14)
    ki = iter(keys)

    def u(shape, bound):
        return jax.random.uniform(next(ki), shape, jnp.float32, -bound, bound)

    params = {}
    in_dims = {"l1": INPUT_DIM, "l2": HIDDEN, "l3": HIDDEN}
    for lyr in ("l1", "l2", "l3"):
        din = in_dims[lyr]
        params[lyr + "_wx"] = u((din, 4 * HIDDEN), k)                # W_ih.T
        params[lyr + "_wh"] = u((HIDDEN, 4 * HIDDEN), k)             # W_hh.T
        b_ih = u((1, 4 * HIDDEN), k)
        b_hh = u((1, 4 * HIDDEN), k)
        params[lyr + "_b"] = b_ih + b_hh
    params["fc_w"] = u((HIDDEN, INPUT_DIM), k)                       # fc1.weight.T
    params["fc_b"] = u((1, INPUT_DIM), k)
    return params


def prepare_kernel_params(params):
    """Fuse W_ih/W_hh into a (2H, 4H) bf16 matrix per layer (x rows zero-padded to 64)
    and pad fc1 to 128 lanes (weights bf16, biases stay f32)."""
    kp = {}
    in_dims = {"l1": INPUT_DIM, "l2": HIDDEN, "l3": HIDDEN}
    for lyr in ("l1", "l2", "l3"):
        din = in_dims[lyr]
        w = jnp.zeros((2 * HIDDEN, 4 * HIDDEN), jnp.float32)
        w = w.at[:din].set(params[lyr + "_wx"])
        w = w.at[HIDDEN:].set(params[lyr + "_wh"])
        kp[lyr + "_w"] = w.astype(jnp.bfloat16)
        kp[lyr + "_b"] = params[lyr + "_b"]
    kp["fc_w"] = (jnp.zeros((HIDDEN, LANES), jnp.float32)
                  .at[:, :INPUT_DIM].set(params["fc_w"])).astype(jnp.bfloat16)
    kp["fc_b"] = jnp.zeros((1, LANES), jnp.float32).at[:, :INPUT_DIM].set(params["fc_b"])
    return kp


# --------------------------------------------------------------- reference ---

def _reference_forward(x, hidden, params, mxu_dtype=jnp.float32):
    """Pure-JAX reference with the original (unfused) PyTorch weight layout.
    mxu_dtype=jnp.bfloat16 mirrors the kernel's bf16 matmul operands (f32 accumulation)."""
    def mm(a, b):
        return jnp.dot(a.astype(mxu_dtype), b.astype(mxu_dtype),
                       preferred_element_type=jnp.float32)

    def cell(x, h, c, wx, wh, b):
        gates = mm(x, wx) + mm(h, wh) + b
        i = jax.nn.sigmoid(gates[:, 0 * HIDDEN:1 * HIDDEN])
        f = jax.nn.sigmoid(gates[:, 1 * HIDDEN:2 * HIDDEN])
        g = jnp.tanh(gates[:, 2 * HIDDEN:3 * HIDDEN])
        o = jax.nn.sigmoid(gates[:, 3 * HIDDEN:4 * HIDDEN])
        c_new = f * c + i * g
        return o * jnp.tanh(c_new), c_new

    (h1, c1), (h2, c2), (h3, c3) = hidden
    h1, c1 = cell(x, h1, c1, params["l1_wx"], params["l1_wh"], params["l1_b"])
    h2, c2 = cell(h1, h2, c2, params["l2_wx"], params["l2_wh"], params["l2_b"])
    h3, c3 = cell(h2, h3, c3, params["l3_wx"], params["l3_wh"], params["l3_b"])
    out = mm(h3[-1:], params["fc_w"])[0] + params["fc_b"][0]
    return out, [(h1, c1), (h2, c2), (h3, c3)]


# ------------------------------------------------------------------- main ----

if __name__ == "__main__":
    B = 8    # batch
    T = 12   # timesteps: not a multiple of TC=8 -> exercises the tail-mask path

    key = jax.random.PRNGKey(0)
    key_p, key_x, key_xs, key_h = jax.random.split(key, 4)
    params = make_params(key_p)
    kparams = prepare_kernel_params(params)

    hkeys = jax.random.split(key_h, 6)
    hidden = [
        (jax.random.normal(hkeys[0], (B, HIDDEN), jnp.float32),
         jax.random.normal(hkeys[1], (B, HIDDEN), jnp.float32)),
        (jax.random.normal(hkeys[2], (B, HIDDEN), jnp.float32),
         jax.random.normal(hkeys[3], (B, HIDDEN), jnp.float32)),
        (jax.random.normal(hkeys[4], (B, HIDDEN), jnp.float32),
         jax.random.normal(hkeys[5], (B, HIDDEN), jnp.float32)),
    ]

    # --- single step: matches the PyTorch module forward ---------------------
    x = jax.random.normal(key_x, (B, INPUT_DIM), jnp.float32)
    out, new_hidden = lstm_regressor_forward(x, hidden, kparams)
    jax.block_until_ready(out)
    assert out.shape == (INPUT_DIM,)

    # tight check vs. a reference that also uses bf16 matmul operands (same math,
    # only accumulation-order differences)
    ref_out_bf, ref_hid_bf = _reference_forward(x, hidden, params, jnp.bfloat16)
    assert jnp.allclose(out, ref_out_bf, atol=2e-3, rtol=2e-3), "single-step output mismatch"
    for (h, c), (rh, rc) in zip(new_hidden, ref_hid_bf):
        assert jnp.allclose(h, rh, atol=2e-3, rtol=2e-3), "hidden mismatch"
        assert jnp.allclose(c, rc, atol=2e-3, rtol=2e-3), "cell mismatch"
    # loose check vs. the full-f32 model: documents the bf16 quantization bound
    ref_out_f32, _ = _reference_forward(x, hidden, params, jnp.float32)
    assert jnp.allclose(out, ref_out_f32, atol=5e-2, rtol=5e-2), "bf16 quantization too large"

    # --- fused T-step sequence: weights + state resident across the grid -----
    xs = jax.random.normal(key_xs, (T, B, INPUT_DIM), jnp.float32)
    outs, hid_final = lstm_regressor_forward_seq(xs, hidden, kparams)
    jax.block_until_ready(outs)
    assert outs.shape == (T, INPUT_DIM)

    ref_hid = hidden
    for t in range(T):
        ref_o, ref_hid = _reference_forward(xs[t], ref_hid, params, jnp.bfloat16)
        assert jnp.allclose(outs[t], ref_o, atol=5e-3, rtol=5e-3), f"seq output mismatch at t={t}"
    for (h, c), (rh, rc) in zip(hid_final, ref_hid):
        assert jnp.allclose(h, rh, atol=5e-3, rtol=5e-3), "seq hidden mismatch"
        assert jnp.allclose(c, rc, atol=5e-3, rtol=5e-3), "seq cell mismatch"

    print("KERNEL_OK")
</pallas_src>

<mosaic_0001>
module attributes {stable_mosaic.version = 11 : i64} {
  func.func @_fused_lstm_kernel(%arg0: i32, %arg1: memref<1x8x5xf32, #tpu.memory_space<vmem>>, %arg2: memref<3x2x8x64xf32, #tpu.memory_space<vmem>>, %arg3: memref<128x256xbf16, #tpu.memory_space<vmem>>, %arg4: memref<1x256xf32, #tpu.memory_space<vmem>>, %arg5: memref<128x256xbf16, #tpu.memory_space<vmem>>, %arg6: memref<1x256xf32, #tpu.memory_space<vmem>>, %arg7: memref<128x256xbf16, #tpu.memory_space<vmem>>, %arg8: memref<1x256xf32, #tpu.memory_space<vmem>>, %arg9: memref<64x128xbf16, #tpu.memory_space<vmem>>, %arg10: memref<1x128xf32, #tpu.memory_space<vmem>>, %arg11: memref<1x1x128xf32, #tpu.memory_space<vmem>>, %arg12: memref<3x2x8x64xf32, #tpu.memory_space<vmem>>, %arg13: memref<3x8x128xf32, #tpu.memory_space<vmem>>, %arg14: memref<3x8x64xf32, #tpu.memory_space<vmem>>, %arg15: memref<1x64xf32, #tpu.memory_space<vmem>>) attributes {dimension_semantics = [#tpu.dimension_semantics<arbitrary>], iteration_bounds = array<i64: 1>, scalar_prefetch = 0 : i64, scratch_operands = 3 : i64, tpu.core_type = #tpu.core_type<tc>, window_params = [{transform_indices = @transform_0, window_bounds = array<i64: 1, 8, 5>}, {pipeline_mode = #tpu.pipeline_mode<synchronous>, transform_indices = @transform_1, window_bounds = array<i64: 3, 2, 8, 64>}, {pipeline_mode = #tpu.pipeline_mode<synchronous>, transform_indices = @transform_2, window_bounds = array<i64: 128, 256>}, {pipeline_mode = #tpu.pipeline_mode<synchronous>, transform_indices = @transform_3, window_bounds = array<i64: 1, 256>}, {pipeline_mode = #tpu.pipeline_mode<synchronous>, transform_indices = @transform_4, window_bounds = array<i64: 128, 256>}, {pipeline_mode = #tpu.pipeline_mode<synchronous>, transform_indices = @transform_5, window_bounds = array<i64: 1, 256>}, {pipeline_mode = #tpu.pipeline_mode<synchronous>, transform_indices = @transform_6, window_bounds = array<i64: 128, 256>}, {pipeline_mode = #tpu.pipeline_mode<synchronous>, transform_indices = @transform_7, window_bounds = array<i64: 1, 256>}, {pipeline_mode = #tpu.pipeline_mode<synchronous>, transform_indices = @transform_8, window_bounds = array<i64: 64, 128>}, {pipeline_mode = #tpu.pipeline_mode<synchronous>, transform_indices = @transform_9, window_bounds = array<i64: 1, 128>}, {transform_indices = @transform_10, window_bounds = array<i64: 1, 1, 128>}, {pipeline_mode = #tpu.pipeline_mode<synchronous>, transform_indices = @transform_11, window_bounds = array<i64: 3, 2, 8, 64>}]} {
    %c0_i32 = arith.constant 0 : i32
    %0 = arith.cmpi eq, %arg0, %c0_i32 : i32
    %1 = arith.extui %0 : i1 to i32
    %c0_i32_0 = arith.constant 0 : i32
    %2 = arith.cmpi ne, %1, %c0_i32_0 : i32
    scf.if %2 {
      %cst_76 = arith.constant 0.000000e+00 : f32
      %121 = vector.broadcast %cst_76 : f32 to vector<3x8x128xf32>
      %c0_77 = arith.constant 0 : index
      %c0_78 = arith.constant 0 : index
      %c0_79 = arith.constant 0 : index
      %122 = vector.load %arg13[%c0_77, %c0_78, %c0_79] : memref<3x8x128xf32, #tpu.memory_space<vmem>>, vector<3x8x128xf32>
      tpu.vector_store %arg13[%c0_77, %c0_78, %c0_79], %121 {strides = array<i32>} : memref<3x8x128xf32, #tpu.memory_space<vmem>>, vector<3x8x128xf32>,
      %c0_80 = arith.constant 0 : index
      %c0_81 = arith.constant 0 : index
      %c0_82 = arith.constant 0 : index
      %c0_83 = arith.constant 0 : index
      %123 = vector.load %arg2[%c0_80, %c0_81, %c0_82, %c0_83] : memref<3x2x8x64xf32, #tpu.memory_space<vmem>>, vector<1x1x8x64xf32>
      %124 = vector.shape_cast %123 : vector<1x1x8x64xf32> to vector<8x64xf32>
      %c0_84 = arith.constant 0 : index
      %c0_85 = arith.constant 0 : index
      %c64_86 = arith.constant 64 : index
      %125 = vector.load %arg13[%c0_84, %c0_85, %c64_86] : memref<3x8x128xf32, #tpu.memory_space<vmem>>, vector<1x8x64xf32>
      %126 = vector.shape_cast %125 : vector<1x8x64xf32> to vector<8x64xf32>
      %127 = vector.shape_cast %124 : vector<8x64xf32> to vector<1x8x64xf32>
      tpu.vector_store %arg13[%c0_84, %c0_85, %c64_86], %127 {strides = array<i32>} : memref<3x8x128xf32, #tpu.memory_space<vmem>>, vector<1x8x64xf32>,
      %c0_87 = arith.constant 0 : index
      %c1_88 = arith.constant 1 : index
      %c0_89 = arith.constant 0 : index
      %c0_90 = arith.constant 0 : index
      %128 = vector.load %arg2[%c0_87, %c1_88, %c0_89, %c0_90] : memref<3x2x8x64xf32, #tpu.memory_space<vmem>>, vector<1x1x8x64xf32>
      %129 = vector.shape_cast %128 : vector<1x1x8x64xf32> to vector<8x64xf32>
      %c0_91 = arith.constant 0 : index
      %c0_92 = arith.constant 0 : index
      %c0_93 = arith.constant 0 : index
      %130 = vector.load %arg14[%c0_91, %c0_92, %c0_93] : memref<3x8x64xf32, #tpu.memory_space<vmem>>, vector<1x8x64xf32>
      %131 = vector.shape_cast %130 : vector<1x8x64xf32> to vector<8x64xf32>
      %132 = vector.shape_cast %129 : vector<8x64xf32> to vector<1x8x64xf32>
      tpu.vector_store %arg14[%c0_91, %c0_92, %c0_93], %132 {strides = array<i32>} : memref<3x8x64xf32, #tpu.memory_space<vmem>>, vector<1x8x64xf32>,
      %c1_94 = arith.constant 1 : index
      %c0_95 = arith.constant 0 : index
      %c0_96 = arith.constant 0 : index
      %c0_97 = arith.constant 0 : index
      %133 = vector.load %arg2[%c1_94, %c0_95, %c0_96, %c0_97] : memref<3x2x8x64xf32, #tpu.memory_space<vmem>>, vector<1x1x8x64xf32>
      %134 = vector.shape_cast %133 : vector<1x1x8x64xf32> to vector<8x64xf32>
      %c1_98 = arith.constant 1 : index
      %c0_99 = arith.constant 0 : index
      %c64_100 = arith.constant 64 : index
      %135 = vector.load %arg13[%c1_98, %c0_99, %c64_100] : memref<3x8x128xf32, #tpu.memory_space<vmem>>, vector<1x8x64xf32>
      %136 = vector.shape_cast %135 : vector<1x8x64xf32> to vector<8x64xf32>
      %137 = vector.shape_cast %134 : vector<8x64xf32> to vector<1x8x64xf32>
      tpu.vector_store %arg13[%c1_98, %c0_99, %c64_100], %137 {strides = array<i32>} : memref<3x8x128xf32, #tpu.memory_space<vmem>>, vector<1x8x64xf32>,
      %c1_101 = arith.constant 1 : index
      %c1_102 = arith.constant 1 : index
      %c0_103 = arith.constant 0 : index
      %c0_104 = arith.constant 0 : index
      %138 = vector.load %arg2[%c1_101, %c1_102, %c0_103, %c0_104] : memref<3x2x8x64xf32, #tpu.memory_space<vmem>>, vector<1x1x8x64xf32>
      %139 = vector.shape_cast %138 : vector<1x1x8x64xf32> to vector<8x64xf32>
      %c1_105 = arith.constant 1 : index
      %c0_106 = arith.constant 0 : index
      %c0_107 = arith.constant 0 : index
      %140 = vector.load %arg14[%c1_105, %c0_106, %c0_107] : memref<3x8x64xf32, #tpu.memory_space<vmem>>, vector<1x8x64xf32>
      %141 = vector.shape_cast %140 : vector<1x8x64xf32> to vector<8x64xf32>
      %142 = vector.shape_cast %139 : vector<8x64xf32> to vector<1x8x64xf32>
      tpu.vector_store %arg14[%c1_105, %c0_106, %c0_107], %142 {strides = array<i32>} : memref<3x8x64xf32, #tpu.memory_space<vmem>>, vector<1x8x64xf32>,
      %c2_108 = arith.constant 2 : index
      %c0_109 = arith.constant 0 : index
      %c0_110 = arith.constant 0 : index
      %c0_111 = arith.constant 0 : index
      %143 = vector.load %arg2[%c2_108, %c0_109, %c0_110, %c0_111] : memref<3x2x8x64xf32, #tpu.memory_space<vmem>>, vector<1x1x8x64xf32>
      %144 = vector.shape_cast %143 : vector<1x1x8x64xf32> to vector<8x64xf32>
      %c2_112 = arith.constant 2 : index
      %c0_113 = arith.constant 0 : index
      %c64_114 = arith.constant 64 : index
      %145 = vector.load %arg13[%c2_112, %c0_113, %c64_114] : memref<3x8x128xf32, #tpu.memory_space<vmem>>, vector<1x8x64xf32>
      %146 = vector.shape_cast %145 : vector<1x8x64xf32> to vector<8x64xf32>
      %147 = vector.shape_cast %144 : vector<8x64xf32> to vector<1x8x64xf32>
      tpu.vector_store %arg13[%c2_112, %c0_113, %c64_114], %147 {strides = array<i32>} : memref<3x8x128xf32, #tpu.memory_space<vmem>>, vector<1x8x64xf32>,
      %c2_115 = arith.constant 2 : index
      %c1_116 = arith.constant 1 : index
      %c0_117 = arith.constant 0 : index
      %c0_118 = arith.constant 0 : index
      %148 = vector.load %arg2[%c2_115, %c1_116, %c0_117, %c0_118] : memref<3x2x8x64xf32, #tpu.memory_space<vmem>>, vector<1x1x8x64xf32>
      %149 = vector.shape_cast %148 : vector<1x1x8x64xf32> to vector<8x64xf32>
      %c2_119 = arith.constant 2 : index
      %c0_120 = arith.constant 0 : index
      %c0_121 = arith.constant 0 : index
      %150 = vector.load %arg14[%c2_119, %c0_120, %c0_121] : memref<3x8x64xf32, #tpu.memory_space<vmem>>, vector<1x8x64xf32>
      %151 = vector.shape_cast %150 : vector<1x8x64xf32> to vector<8x64xf32>
      %152 = vector.shape_cast %149 : vector<8x64xf32> to vector<1x8x64xf32>
      tpu.vector_store %arg14[%c2_119, %c0_120, %c0_121], %152 {strides = array<i32>} : memref<3x8x64xf32, #tpu.memory_space<vmem>>, vector<1x8x64xf32>,
    } else {
    }
    %c0 = arith.constant 0 : index
    %c0_1 = arith.constant 0 : index
    %c0_2 = arith.constant 0 : index
    %3 = vector.load %arg1[%c0, %c0_1, %c0_2] : memref<1x8x5xf32, #tpu.memory_space<vmem>>, vector<1x8x5xf32>
    %4 = vector.shape_cast %3 : vector<1x8x5xf32> to vector<8x5xf32>
    %c0_3 = arith.constant 0 : index
    %c0_4 = arith.constant 0 : index
    %c0_5 = arith.constant 0 : index
    %5 = vector.load %arg13[%c0_3, %c0_4, %c0_5] : memref<3x8x128xf32, #tpu.memory_space<vmem>>, vector<1x8x5xf32>
    %6 = vector.shape_cast %5 : vector<1x8x5xf32> to vector<8x5xf32>
    %7 = vector.shape_cast %4 : vector<8x5xf32> to vector<1x8x5xf32>
    tpu.vector_store %arg13[%c0_3, %c0_4, %c0_5], %7 {strides = array<i32>} : memref<3x8x128xf32, #tpu.memory_space<vmem>>, vector<1x8x5xf32>,
    %c0_6 = arith.constant 0 : index
    %c0_7 = arith.constant 0 : index
    %c0_8 = arith.constant 0 : index
    %8 = vector.load %arg13[%c0_6, %c0_7, %c0_8] : memref<3x8x128xf32, #tpu.memory_space<vmem>>, vector<1x8x128xf32>
    %9 = vector.shape_cast %8 : vector<1x8x128xf32> to vector<8x128xf32>
    %10 = arith.truncf %9 : vector<8x128xf32> to vector<8x128xbf16>
    %c0_9 = arith.constant 0 : index
    %c0_10 = arith.constant 0 : index
    %11 = vector.load %arg3[%c0_9, %c0_10] : memref<128x256xbf16, #tpu.memory_space<vmem>>, vector<128x256xbf16>
    %cst = arith.constant dense<0.000000e+00> : vector<8x256xf32>
    %12 = tpu.matmul %10, %11, %cst {dimension_numbers = #tpu.dot_dimension_numbers<[1], [0], [0], [1], [0, 0, 1, 1], [], []>} : vector<8x128xbf16>, vector<128x256xbf16>, vector<8x256xf32> -> vector<8x256xf32>
    %c0_11 = arith.constant 0 : index
    %c0_12 = arith.constant 0 : index
    %13 = vector.load %arg4[%c0_11, %c0_12] : memref<1x256xf32, #tpu.memory_space<vmem>>, vector<1x256xf32>
    %14 = vector.broadcast %13 : vector<1x256xf32> to vector<8x256xf32>
    %15 = arith.addf %12, %14 : vector<8x256xf32>
    %16 = arith.negf %15 : vector<8x256xf32>
    %17 = math.exp %16 : vector<8x256xf32>
    %cst_13 = arith.constant 1.000000e+00 : f32
    %18 = vector.broadcast %cst_13 : f32 to vector<8x256xf32>
    %19 = arith.addf %18, %17 : vector<8x256xf32>
    %20 = arith.divf %18, %19 : vector<8x256xf32>
    %21 = vector.extract_strided_slice %20 {offsets = [0, 0], sizes = [8, 64], strides = [1, 1]} : vector<8x256xf32> to vector<8x64xf32>
    %22 = vector.extract_strided_slice %20 {offsets = [0, 64], sizes = [8, 64], strides = [1, 1]} : vector<8x256xf32> to vector<8x64xf32>
    %23 = vector.extract_strided_slice %20 {offsets = [0, 192], sizes = [8, 64], strides = [1, 1]} : vector<8x256xf32> to vector<8x64xf32>
    %24 = vector.extract_strided_slice %15 {offsets = [0, 128], sizes = [8, 64], strides = [1, 1]} : vector<8x256xf32> to vector<8x64xf32>
    %25 = math.tanh %24 : vector<8x64xf32>
    %c0_14 = arith.constant 0 : index
    %c0_15 = arith.constant 0 : index
    %c0_16 = arith.constant 0 : index
    %26 = vector.load %arg14[%c0_14, %c0_15, %c0_16] : memref<3x8x64xf32, #tpu.memory_space<vmem>>, vector<1x8x64xf32>
    %27 = vector.shape_cast %26 : vector<1x8x64xf32> to vector<8x64xf32>
    %28 = arith.mulf %22, %27 : vector<8x64xf32>
    %29 = arith.mulf %21, %25 : vector<8x64xf32>
    %30 = arith.addf %28, %29 : vector<8x64xf32>
    %31 = math.tanh %30 : vector<8x64xf32>
    %32 = arith.mulf %23, %31 : vector<8x64xf32>
    %c0_17 = arith.constant 0 : index
    %c0_18 = arith.constant 0 : index
    %c0_19 = arith.constant 0 : index
    %33 = vector.load %arg14[%c0_17, %c0_18, %c0_19] : memref<3x8x64xf32, #tpu.memory_space<vmem>>, vector<1x8x64xf32>
    %34 = vector.shape_cast %33 : vector<1x8x64xf32> to vector<8x64xf32>
    %35 = vector.shape_cast %30 : vector<8x64xf32> to vector<1x8x64xf32>
    tpu.vector_store %arg14[%c0_17, %c0_18, %c0_19], %35 {strides = array<i32>} : memref<3x8x64xf32, #tpu.memory_space<vmem>>, vector<1x8x64xf32>,
    %c0_20 = arith.constant 0 : index
    %c0_21 = arith.constant 0 : index
    %c64 = arith.constant 64 : index
    %36 = vector.load %arg13[%c0_20, %c0_21, %c64] : memref<3x8x128xf32, #tpu.memory_space<vmem>>, vector<1x8x64xf32>
    %37 = vector.shape_cast %36 : vector<1x8x64xf32> to vector<8x64xf32>
    %38 = vector.shape_cast %32 : vector<8x64xf32> to vector<1x8x64xf32>
    tpu.vector_store %arg13[%c0_20, %c0_21, %c64], %38 {strides = array<i32>} : memref<3x8x128xf32, #tpu.memory_space<vmem>>, vector<1x8x64xf32>,
    %c1 = arith.constant 1 : index
    %c0_22 = arith.constant 0 : index
    %c0_23 = arith.constant 0 : index
    %39 = vector.load %arg13[%c1, %c0_22, %c0_23] : memref<3x8x128xf32, #tpu.memory_space<vmem>>, vector<1x8x64xf32>
    %40 = vector.shape_cast %39 : vector<1x8x64xf32> to vector<8x64xf32>
    %41 = vector.shape_cast %32 : vector<8x64xf32> to vector<1x8x64xf32>
    tpu.vector_store %arg13[%c1, %c0_22, %c0_23], %41 {strides = array<i32>} : memref<3x8x128xf32, #tpu.memory_space<vmem>>, vector<1x8x64xf32>,
    %c1_24 = arith.constant 1 : index
    %c0_25 = arith.constant 0 : index
    %c0_26 = arith.constant 0 : index
    %42 = vector.load %arg13[%c1_24, %c0_25, %c0_26] : memref<3x8x128xf32, #tpu.memory_space<vmem>>, vector<1x8x128xf32>
    %43 = vector.shape_cast %42 : vector<1x8x128xf32> to vector<8x128xf32>
    %44 = arith.truncf %43 : vector<8x128xf32> to vector<8x128xbf16>
    %c0_27 = arith.constant 0 : index
    %c0_28 = arith.constant 0 : index
    %45 = vector.load %arg5[%c0_27, %c0_28] : memref<128x256xbf16, #tpu.memory_space<vmem>>, vector<128x256xbf16>
    %cst_29 = arith.constant dense<0.000000e+00> : vector<8x256xf32>
    %46 = tpu.matmul %44, %45, %cst_29 {dimension_numbers = #tpu.dot_dimension_numbers<[1], [0], [0], [1], [0, 0, 1, 1], [], []>} : vector<8x128xbf16>, vector<128x256xbf16>, vector<8x256xf32> -> vector<8x256xf32>
    %c0_30 = arith.constant 0 : index
    %c0_31 = arith.constant 0 : index
    %47 = vector.load %arg6[%c0_30, %c0_31] : memref<1x256xf32, #tpu.memory_space<vmem>>, vector<1x256xf32>
    %48 = vector.broadcast %47 : vector<1x256xf32> to vector<8x256xf32>
    %49 = arith.addf %46, %48 : vector<8x256xf32>
    %50 = arith.negf %49 : vector<8x256xf32>
    %51 = math.exp %50 : vector<8x256xf32>
    %cst_32 = arith.constant 1.000000e+00 : f32
    %52 = vector.broadcast %cst_32 : f32 to vector<8x256xf32>
    %53 = arith.addf %52, %51 : vector<8x256xf32>
    %54 = arith.divf %52, %53 : vector<8x256xf32>
    %55 = vector.extract_strided_slice %54 {offsets = [0, 0], sizes = [8, 64], strides = [1, 1]} : vector<8x256xf32> to vector<8x64xf32>
    %56 = vector.extract_strided_slice %54 {offsets = [0, 64], sizes = [8, 64], strides = [1, 1]} : vector<8x256xf32> to vector<8x64xf32>
    %57 = vector.extract_strided_slice %54 {offsets = [0, 192], sizes = [8, 64], strides = [1, 1]} : vector<8x256xf32> to vector<8x64xf32>
    %58 = vector.extract_strided_slice %49 {offsets = [0, 128], sizes = [8, 64], strides = [1, 1]} : vector<8x256xf32> to vector<8x64xf32>
    %59 = math.tanh %58 : vector<8x64xf32>
    %c1_33 = arith.constant 1 : index
    %c0_34 = arith.constant 0 : index
    %c0_35 = arith.constant 0 : index
    %60 = vector.load %arg14[%c1_33, %c0_34, %c0_35] : memref<3x8x64xf32, #tpu.memory_space<vmem>>, vector<1x8x64xf32>
    %61 = vector.shape_cast %60 : vector<1x8x64xf32> to vector<8x64xf32>
    %62 = arith.mulf %56, %61 : vector<8x64xf32>
    %63 = arith.mulf %55, %59 : vector<8x64xf32>
    %64 = arith.addf %62, %63 : vector<8x64xf32>
    %65 = math.tanh %64 : vector<8x64xf32>
    %66 = arith.mulf %57, %65 : vector<8x64xf32>
    %c1_36 = arith.constant 1 : index
    %c0_37 = arith.constant 0 : index
    %c0_38 = arith.constant 0 : index
    %67 = vector.load %arg14[%c1_36, %c0_37, %c0_38] : memref<3x8x64xf32, #tpu.memory_space<vmem>>, vector<1x8x64xf32>
    %68 = vector.shape_cast %67 : vector<1x8x64xf32> to vector<8x64xf32>
    %69 = vector.shape_cast %64 : vector<8x64xf32> to vector<1x8x64xf32>
    tpu.vector_store %arg14[%c1_36, %c0_37, %c0_38], %69 {strides = array<i32>} : memref<3x8x64xf32, #tpu.memory_space<vmem>>, vector<1x8x64xf32>,
    %c1_39 = arith.constant 1 : index
    %c0_40 = arith.constant 0 : index
    %c64_41 = arith.constant 64 : index
    %70 = vector.load %arg13[%c1_39, %c0_40, %c64_41] : memref<3x8x128xf32, #tpu.memory_space<vmem>>, vector<1x8x64xf32>
    %71 = vector.shape_cast %70 : vector<1x8x64xf32> to vector<8x64xf32>
    %72 = vector.shape_cast %66 : vector<8x64xf32> to vector<1x8x64xf32>
    tpu.vector_store %arg13[%c1_39, %c0_40, %c64_41], %72 {strides = array<i32>} : memref<3x8x128xf32, #tpu.memory_space<vmem>>, vector<1x8x64xf32>,
    %c2 = arith.constant 2 : index
    %c0_42 = arith.constant 0 : index
    %c0_43 = arith.constant 0 : index
    %73 = vector.load %arg13[%c2, %c0_42, %c0_43] : memref<3x8x128xf32, #tpu.memory_space<vmem>>, vector<1x8x64xf32>
    %74 = vector.shape_cast %73 : vector<1x8x64xf32> to vector<8x64xf32>
    %75 = vector.shape_cast %66 : vector<8x64xf32> to vector<1x8x64xf32>
    tpu.vector_store %arg13[%c2, %c0_42, %c0_43], %75 {strides = array<i32>} : memref<3x8x128xf32, #tpu.memory_space<vmem>>, vector<1x8x64xf32>,
    %c2_44 = arith.constant 2 : index
    %c0_45 = arith.constant 0 : index
    %c0_46 = arith.constant 0 : index
    %76 = vector.load %arg13[%c2_44, %c0_45, %c0_46] : memref<3x8x128xf32, #tpu.memory_space<vmem>>, vector<1x8x128xf32>
    %77 = vector.shape_cast %76 : vector<1x8x128xf32> to vector<8x128xf32>
    %78 = arith.truncf %77 : vector<8x128xf32> to vector<8x128xbf16>
    %c0_47 = arith.constant 0 : index
    %c0_48 = arith.constant 0 : index
    %79 = vector.load %arg7[%c0_47, %c0_48] : memref<128x256xbf16, #tpu.memory_space<vmem>>, vector<128x256xbf16>
    %cst_49 = arith.constant dense<0.000000e+00> : vector<8x256xf32>
    %80 = tpu.matmul %78, %79, %cst_49 {dimension_numbers = #tpu.dot_dimension_numbers<[1], [0], [0], [1], [0, 0, 1, 1], [], []>} : vector<8x128xbf16>, vector<128x256xbf16>, vector<8x256xf32> -> vector<8x256xf32>
    %c0_50 = arith.constant 0 : index
    %c0_51 = arith.constant 0 : index
    %81 = vector.load %arg8[%c0_50, %c0_51] : memref<1x256xf32, #tpu.memory_space<vmem>>, vector<1x256xf32>
    %82 = vector.broadcast %81 : vector<1x256xf32> to vector<8x256xf32>
    %83 = arith.addf %80, %82 : vector<8x256xf32>
    %84 = arith.negf %83 : vector<8x256xf32>
    %85 = math.exp %84 : vector<8x256xf32>
    %cst_52 = arith.constant 1.000000e+00 : f32
    %86 = vector.broadcast %cst_52 : f32 to vector<8x256xf32>
    %87 = arith.addf %86, %85 : vector<8x256xf32>
    %88 = arith.divf %86, %87 : vector<8x256xf32>
    %89 = vector.extract_strided_slice %88 {offsets = [0, 0], sizes = [8, 64], strides = [1, 1]} : vector<8x256xf32> to vector<8x64xf32>
    %90 = vector.extract_strided_slice %88 {offsets = [0, 64], sizes = [8, 64], strides = [1, 1]} : vector<8x256xf32> to vector<8x64xf32>
    %91 = vector.extract_strided_slice %88 {offsets = [0, 192], sizes = [8, 64], strides = [1, 1]} : vector<8x256xf32> to vector<8x64xf32>
    %92 = vector.extract_strided_slice %83 {offsets = [0, 128], sizes = [8, 64], strides = [1, 1]} : vector<8x256xf32> to vector<8x64xf32>
    %93 = math.tanh %92 : vector<8x64xf32>
    %c2_53 = arith.constant 2 : index
    %c0_54 = arith.constant 0 : index
    %c0_55 = arith.constant 0 : index
    %94 = vector.load %arg14[%c2_53, %c0_54, %c0_55] : memref<3x8x64xf32, #tpu.memory_space<vmem>>, vector<1x8x64xf32>
    %95 = vector.shape_cast %94 : vector<1x8x64xf32> to vector<8x64xf32>
    %96 = arith.mulf %90, %95 : vector<8x64xf32>
    %97 = arith.mulf %89, %93 : vector<8x64xf32>
    %98 = arith.addf %96, %97 : vector<8x64xf32>
    %99 = math.tanh %98 : vector<8x64xf32>
    %100 = arith.mulf %91, %99 : vector<8x64xf32>
    %c2_56 = arith.constant 2 : index
    %c0_57 = arith.constant 0 : index
    %c0_58 = arith.constant 0 : index
    %101 = vector.load %arg14[%c2_56, %c0_57, %c0_58] : memref<3x8x64xf32, #tpu.memory_space<vmem>>, vector<1x8x64xf32>
    %102 = vector.shape_cast %101 : vector<1x8x64xf32> to vector<8x64xf32>
    %103 = vector.shape_cast %98 : vector<8x64xf32> to vector<1x8x64xf32>
    tpu.vector_store %arg14[%c2_56, %c0_57, %c0_58], %103 {strides = array<i32>} : memref<3x8x64xf32, #tpu.memory_space<vmem>>, vector<1x8x64xf32>,
    %c2_59 = arith.constant 2 : index
    %c0_60 = arith.constant 0 : index
    %c64_61 = arith.constant 64 : index
    %104 = vector.load %arg13[%c2_59, %c0_60, %c64_61] : memref<3x8x128xf32, #tpu.memory_space<vmem>>, vector<1x8x64xf32>
    %105 = vector.shape_cast %104 : vector<1x8x64xf32> to vector<8x64xf32>
    %106 = vector.shape_cast %100 : vector<8x64xf32> to vector<1x8x64xf32>
    tpu.vector_store %arg13[%c2_59, %c0_60, %c64_61], %106 {strides = array<i32>} : memref<3x8x128xf32, #tpu.memory_space<vmem>>, vector<1x8x64xf32>,
    %107 = vector.extract_strided_slice %100 {offsets = [7, 0], sizes = [1, 64], strides = [1, 1]} : vector<8x64xf32> to vector<1x64xf32>
    %c0_62 = arith.constant 0 : index
    %c0_63 = arith.constant 0 : index
    %108 = vector.load %arg15[%c0_62, %c0_63] : memref<1x64xf32, #tpu.memory_space<vmem>>, vector<1x64xf32>
    tpu.vector_store %arg15[%c0_62, %c0_63], %107 {strides = array<i32>} : memref<1x64xf32, #tpu.memory_space<vmem>>, vector<1x64xf32>,
    %c0_64 = arith.constant 0 : index
    %c0_65 = arith.constant 0 : index
    %109 = vector.load %arg15[%c0_64, %c0_65] : memref<1x64xf32, #tpu.memory_space<vmem>>, vector<1x64xf32>
    %110 = arith.truncf %109 : vector<1x64xf32> to vector<1x64xbf16>
    %c0_66 = arith.constant 0 : index
    %c0_67 = arith.constant 0 : index
    %111 = vector.load %arg9[%c0_66, %c0_67] : memref<64x128xbf16, #tpu.memory_space<vmem>>, vector<64x128xbf16>
    %cst_68 = arith.constant dense<0.000000e+00> : vector<1x128xf32>
    %112 = tpu.matmul %110, %111, %cst_68 {dimension_numbers = #tpu.dot_dimension_numbers<[1], [0], [0], [1], [0, 0, 1, 1], [], []>} : vector<1x64xbf16>, vector<64x128xbf16>, vector<1x128xf32> -> vector<1x128xf32>
    %c0_69 = arith.constant 0 : index
    %c0_70 = arith.constant 0 : index
    %113 = vector.load %arg10[%c0_69, %c0_70] : memref<1x128xf32, #tpu.memory_space<vmem>>, vector<1x128xf32>
    %114 = arith.addf %112, %113 : vector<1x128xf32>
    %c0_71 = arith.constant 0 : index
    %c0_72 = arith.constant 0 : index
    %c0_73 = arith.constant 0 : index
    %115 = vector.load %arg11[%c0_71, %c0_72, %c0_73] : memref<1x1x128xf32, #tpu.memory_space<vmem>>, vector<1x1x128xf32>
    %116 = vector.shape_cast %115 : vector<1x1x128xf32> to vector<1x128xf32>
    %117 = vector.shape_cast %114 : vector<1x128xf32> to vector<1x1x128xf32>
    tpu.vector_store %arg11[%c0_71, %c0_72, %c0_73], %117 {strides = array<i32>} : memref<1x1x128xf32, #tpu.memory_space<vmem>>, vector<1x1x128xf32>,
    %c0_i32_74 = arith.constant 0 : i32
    %118 = arith.cmpi eq, %arg0, %c0_i32_74 : i32
    %119 = arith.extui %118 : i1 to i32
    %c0_i32_75 = arith.constant 0 : i32
    %120 = arith.cmpi ne, %119, %c0_i32_75 : i32
    scf.if %120 {
      %c0_76 = arith.constant 0 : index
      %c0_77 = arith.constant 0 : index
      %c64_78 = arith.constant 64 : index
      %121 = vector.load %arg13[%c0_76, %c0_77, %c64_78] : memref<3x8x128xf32, #tpu.memory_space<vmem>>, vector<1x8x64xf32>
      %122 = vector.shape_cast %121 : vector<1x8x64xf32> to vector<8x64xf32>
      %c0_79 = arith.constant 0 : index
      %c0_80 = arith.constant 0 : index
      %c0_81 = arith.constant 0 : index
      %c0_82 = arith.constant 0 : index
      %123 = vector.load %arg12[%c0_79, %c0_80, %c0_81, %c0_82] : memref<3x2x8x64xf32, #tpu.memory_space<vmem>>, vector<1x1x8x64xf32>
      %124 = vector.shape_cast %123 : vector<1x1x8x64xf32> to vector<8x64xf32>
      %125 = vector.shape_cast %122 : vector<8x64xf32> to vector<1x1x8x64xf32>
      tpu.vector_store %arg12[%c0_79, %c0_80, %c0_81, %c0_82], %125 {strides = array<i32>} : memref<3x2x8x64xf32, #tpu.memory_space<vmem>>, vector<1x1x8x64xf32>,
      %c0_83 = arith.constant 0 : index
      %c0_84 = arith.constant 0 : index
      %c0_85 = arith.constant 0 : index
      %126 = vector.load %arg14[%c0_83, %c0_84, %c0_85] : memref<3x8x64xf32, #tpu.memory_space<vmem>>, vector<1x8x64xf32>
      %127 = vector.shape_cast %126 : vector<1x8x64xf32> to vector<8x64xf32>
      %c0_86 = arith.constant 0 : index
      %c1_87 = arith.constant 1 : index
      %c0_88 = arith.constant 0 : index
      %c0_89 = arith.constant 0 : index
      %128 = vector.load %arg12[%c0_86, %c1_87, %c0_88, %c0_89] : memref<3x2x8x64xf32, #tpu.memory_space<vmem>>, vector<1x1x8x64xf32>
      %129 = vector.shape_cast %128 : vector<1x1x8x64xf32> to vector<8x64xf32>
      %130 = vector.shape_cast %127 : vector<8x64xf32> to vector<1x1x8x64xf32>
      tpu.vector_store %arg12[%c0_86, %c1_87, %c0_88, %c0_89], %130 {strides = array<i32>} : memref<3x2x8x64xf32, #tpu.memory_space<vmem>>, vector<1x1x8x64xf32>,
      %c1_90 = arith.constant 1 : index
      %c0_91 = arith.constant 0 : index
      %c64_92 = arith.constant 64 : index
      %131 = vector.load %arg13[%c1_90, %c0_91, %c64_92] : memref<3x8x128xf32, #tpu.memory_space<vmem>>, vector<1x8x64xf32>
      %132 = vector.shape_cast %131 : vector<1x8x64xf32> to vector<8x64xf32>
      %c1_93 = arith.constant 1 : index
      %c0_94 = arith.constant 0 : index
      %c0_95 = arith.constant 0 : index
      %c0_96 = arith.constant 0 : index
      %133 = vector.load %arg12[%c1_93, %c0_94, %c0_95, %c0_96] : memref<3x2x8x64xf32, #tpu.memory_space<vmem>>, vector<1x1x8x64xf32>
      %134 = vector.shape_cast %133 : vector<1x1x8x64xf32> to vector<8x64xf32>
      %135 = vector.shape_cast %132 : vector<8x64xf32> to vector<1x1x8x64xf32>
      tpu.vector_store %arg12[%c1_93, %c0_94, %c0_95, %c0_96], %135 {strides = array<i32>} : memref<3x2x8x64xf32, #tpu.memory_space<vmem>>, vector<1x1x8x64xf32>,
      %c1_97 = arith.constant 1 : index
      %c0_98 = arith.constant 0 : index
      %c0_99 = arith.constant 0 : index
      %136 = vector.load %arg14[%c1_97, %c0_98, %c0_99] : memref<3x8x64xf32, #tpu.memory_space<vmem>>, vector<1x8x64xf32>
      %137 = vector.shape_cast %136 : vector<1x8x64xf32> to vector<8x64xf32>
      %c1_100 = arith.constant 1 : index
      %c1_101 = arith.constant 1 : index
      %c0_102 = arith.constant 0 : index
      %c0_103 = arith.constant 0 : index
      %138 = vector.load %arg12[%c1_100, %c1_101, %c0_102, %c0_103] : memref<3x2x8x64xf32, #tpu.memory_space<vmem>>, vector<1x1x8x64xf32>
      %139 = vector.shape_cast %138 : vector<1x1x8x64xf32> to vector<8x64xf32>
      %140 = vector.shape_cast %137 : vector<8x64xf32> to vector<1x1x8x64xf32>
      tpu.vector_store %arg12[%c1_100, %c1_101, %c0_102, %c0_103], %140 {strides = array<i32>} : memref<3x2x8x64xf32, #tpu.memory_space<vmem>>, vector<1x1x8x64xf32>,
      %c2_104 = arith.constant 2 : index
      %c0_105 = arith.constant 0 : index
      %c64_106 = arith.constant 64 : index
      %141 = vector.load %arg13[%c2_104, %c0_105, %c64_106] : memref<3x8x128xf32, #tpu.memory_space<vmem>>, vector<1x8x64xf32>
      %142 = vector.shape_cast %141 : vector<1x8x64xf32> to vector<8x64xf32>
      %c2_107 = arith.constant 2 : index
      %c0_108 = arith.constant 0 : index
      %c0_109 = arith.constant 0 : index
      %c0_110 = arith.constant 0 : index
      %143 = vector.load %arg12[%c2_107, %c0_108, %c0_109, %c0_110] : memref<3x2x8x64xf32, #tpu.memory_space<vmem>>, vector<1x1x8x64xf32>
      %144 = vector.shape_cast %143 : vector<1x1x8x64xf32> to vector<8x64xf32>
      %145 = vector.shape_cast %142 : vector<8x64xf32> to vector<1x1x8x64xf32>
      tpu.vector_store %arg12[%c2_107, %c0_108, %c0_109, %c0_110], %145 {strides = array<i32>} : memref<3x2x8x64xf32, #tpu.memory_space<vmem>>, vector<1x1x8x64xf32>,
      %c2_111 = arith.constant 2 : index
      %c0_112 = arith.constant 0 : index
      %c0_113 = arith.constant 0 : index
      %146 = vector.load %arg14[%c2_111, %c0_112, %c0_113] : memref<3x8x64xf32, #tpu.memory_space<vmem>>, vector<1x8x64xf32>
      %147 = vector.shape_cast %146 : vector<1x8x64xf32> to vector<8x64xf32>
      %c2_114 = arith.constant 2 : index
      %c1_115 = arith.constant 1 : index
      %c0_116 = arith.constant 0 : index
      %c0_117 = arith.constant 0 : index
      %148 = vector.load %arg12[%c2_114, %c1_115, %c0_116, %c0_117] : memref<3x2x8x64xf32, #tpu.memory_space<vmem>>, vector<1x1x8x64xf32>
      %149 = vector.shape_cast %148 : vector<1x1x8x64xf32> to vector<8x64xf32>
      %150 = vector.shape_cast %147 : vector<8x64xf32> to vector<1x1x8x64xf32>
      tpu.vector_store %arg12[%c2_114, %c1_115, %c0_116, %c0_117], %150 {strides = array<i32>} : memref<3x2x8x64xf32, #tpu.memory_space<vmem>>, vector<1x1x8x64xf32>,
    } else {
    }
    return
  }
  func.func @transform_0(%arg0: i32) -> (i32, i32, i32) {
    %c0_i32 = arith.constant 0 : i32
    %c0_i32_0 = arith.constant 0 : i32
    %c0_i32_1 = arith.constant 0 : i32
    return %arg0, %c0_i32, %c0_i32_0 : i32, i32, i32
  }
  func.func @transform_1(%arg0: i32) -> (i32, i32, i32, i32) {
    %c0_i32 = arith.constant 0 : i32
    %c0_i32_0 = arith.constant 0 : i32
    %c0_i32_1 = arith.constant 0 : i32
    %c0_i32_2 = arith.constant 0 : i32
    %c0_i32_3 = arith.constant 0 : i32
    return %c0_i32, %c0_i32_0, %c0_i32_1, %c0_i32_2 : i32, i32, i32, i32
  }
  func.func @transform_2(%arg0: i32) -> (i32, i32) {
    %c0_i32 = arith.constant 0 : i32
    %c0_i32_0 = arith.constant 0 : i32
    %c0_i32_1 = arith.constant 0 : i32
    return %c0_i32, %c0_i32_0 : i32, i32
  }
  func.func @transform_3(%arg0: i32) -> (i32, i32) {
    %c0_i32 = arith.constant 0 : i32
    %c0_i32_0 = arith.constant 0 : i32
    %c0_i32_1 = arith.constant 0 : i32
    return %c0_i32, %c0_i32_0 : i32, i32
  }
  func.func @transform_4(%arg0: i32) -> (i32, i32) {
    %c0_i32 = arith.constant 0 : i32
    %c0_i32_0 = arith.constant 0 : i32
    %c0_i32_1 = arith.constant 0 : i32
    return %c0_i32, %c0_i32_0 : i32, i32
  }
  func.func @transform_5(%arg0: i32) -> (i32, i32) {
    %c0_i32 = arith.constant 0 : i32
    %c0_i32_0 = arith.constant 0 : i32
    %c0_i32_1 = arith.constant 0 : i32
    return %c0_i32, %c0_i32_0 : i32, i32
  }
  func.func @transform_6(%arg0: i32) -> (i32, i32) {
    %c0_i32 = arith.constant 0 : i32
    %c0_i32_0 = arith.constant 0 : i32
    %c0_i32_1 = arith.constant 0 : i32
    return %c0_i32, %c0_i32_0 : i32, i32
  }
  func.func @transform_7(%arg0: i32) -> (i32, i32) {
    %c0_i32 = arith.constant 0 : i32
    %c0_i32_0 = arith.constant 0 : i32
    %c0_i32_1 = arith.constant 0 : i32
    return %c0_i32, %c0_i32_0 : i32, i32
  }
  func.func @transform_8(%arg0: i32) -> (i32, i32) {
    %c0_i32 = arith.constant 0 : i32
    %c0_i32_0 = arith.constant 0 : i32
    %c0_i32_1 = arith.constant 0 : i32
    return %c0_i32, %c0_i32_0 : i32, i32
  }
  func.func @transform_9(%arg0: i32) -> (i32, i32) {
    %c0_i32 = arith.constant 0 : i32
    %c0_i32_0 = arith.constant 0 : i32
    %c0_i32_1 = arith.constant 0 : i32
    return %c0_i32, %c0_i32_0 : i32, i32
  }
  func.func @transform_10(%arg0: i32) -> (i32, i32, i32) {
    %c0_i32 = arith.constant 0 : i32
    %c0_i32_0 = arith.constant 0 : i32
    %c0_i32_1 = arith.constant 0 : i32
    return %arg0, %c0_i32, %c0_i32_0 : i32, i32, i32
  }
  func.func @transform_11(%arg0: i32) -> (i32, i32, i32, i32) {
    %c0_i32 = arith.constant 0 : i32
    %c0_i32_0 = arith.constant 0 : i32
    %c0_i32_1 = arith.constant 0 : i32
    %c0_i32_2 = arith.constant 0 : i32
    %c0_i32_3 = arith.constant 0 : i32
    return %c0_i32, %c0_i32_0, %c0_i32_1, %c0_i32_2 : i32, i32, i32, i32
  }
}

</mosaic_0001>

<bundles_post_ra>
// kernel: lstm_regressor_forward_seq.1
= control target key start
LH: loop header
LB: loop body
LE: loop exit
PB: predicated region body
PF: predicated region fallthrough
CT: control target
= control target key end

     0   :  { %17 = vsyncpa [#allocation6], 0  ;;  %s1537_s0 = inlined_call_operand.vmem [shape: f32[1,8,5], index: 0, kind: input, shape index: {}]   ;;  %s1538_s1 = inlined_call_operand.vmem [shape: f32[3,2,8,64], index: 1, kind: input, shape index: {}, may-alias: {1,11}]   ;;  %s1539_s2 = inlined_call_operand.vmem [shape: bf16[128,256], index: 2, kind: input, shape index: {}]   ;;  %s1540_s3 = inlined_call_operand.vmem [shape: f32[1,256], index: 3, kind: input, shape index: {}]   ;;  %s1541_s4 = inlined_call_operand.hbm [shape: bf16[128,256], index: 4, kind: input, shape index: {}]   ;;  %s1542_s5 = inlined_call_operand.vmem [shape: f32[1,256], index: 5, kind: input, shape index: {}]   ;;  %s1543_s6 = inlined_call_operand.hbm [shape: bf16[128,256], index: 6, kind: input, shape index: {}]   ;;  %s1544_s7 = inlined_call_operand.vmem [shape: f32[1,256], index: 7, kind: input, shape index: {}]   ;;  %s1545_s8 = inlined_call_operand.hbm [shape: bf16[64,128], index: 8, kind: input, shape index: {}]   ;;  %s1546_s9 = inlined_call_operand.vmem [shape: f32[1,128], index: 9, kind: input, shape index: {}]   ;;  %s1547_s10 = inlined_call_operand.hbm [shape: f32[1,1,128], index: 10, kind: output, shape index: {0}]   ;;  %s1548_s11 = inlined_call_operand.vmem [shape: f32[3,2,8,64], index: 11, kind: output, shape index: {1}, may-alias: {1,11}]  }
   0x1   :  { %18 = vsyncpa [#allocation9], 0 }
   0x2   :  { %19 = vsyncpa [#allocation7], 0  ;;  %s47_s19 = sshll.u32 %s1543_s6, 4  ;;  %s1250_s20 = smov [#allocation8]   ;;  %s48_s19 = int_to_ptr.hbm [resolvable:$true] %s47_s19 }
   0x3   :  { %s49_s21 = sshll.u32 %s1250_s20, 4  ;;  %s32_s24 = sshll.u32 %s1541_s4, 4  ;;  %s50_s21 = int_to_ptr.vmem [resolvable:$true] %s49_s21  ;;  %s33_s24 = int_to_ptr.hbm [resolvable:$true] %s32_s24 }
   0x4   :  { %s1251_s25 = smov 128   ;;  %s1252_s26 = smov 8  }
   0x5   :  { %55 = dma.hbm_to_vmem [thread:$0]  %s48_s19, 2048, %s50_s21, [#allocation9], %s1251_s25, %s1251_s25, %s1252_s26  }
   0x6   :  { %s1253_s27 = smov [#allocation5]   ;;  %s62_s12 = sshll.u32 %s1545_s8, 4  ;;  %s63_s12 = int_to_ptr.hbm [resolvable:$true] %s62_s12 }
   0x7   :  { %s34_s28 = sshll.u32 %s1253_s27, 4  ;;  %s1254_s6 = smov [#allocation10]   ;;  %s35_s28 = int_to_ptr.vmem [resolvable:$true] %s34_s28 }
   0x8   :  { %40 = dma.hbm_to_vmem [thread:$0]  %s33_s24, 2048, %s35_s28, [#allocation6], %s1251_s25, %s1251_s25, %s1252_s26  }
   0x9   :  { %s64_s13 = sshll.u32 %s1254_s6, 4  ;;  %s1255_s14 = smov 64   ;;  %s65_s13 = int_to_ptr.vmem [resolvable:$true] %s64_s13 }
   0xa   :  { %s1256_s15 = smov 4  }
   0xb   :  { %70 = dma.hbm_to_vmem [thread:$0]  %s63_s12, 512, %s65_s13, [#allocation9], %s1255_s14, %s1255_s14, %s1256_s15  }
   0xc   :  { %1244 = dma.done.wait [#allocation6], 2048  }
   0xd   :  { %1245 = vsyncadd [#allocation6], 4294965248 }
   0xe   :  { %1246 = dma.done.wait [#allocation9], 2560  }
   0xf   :  { %1247 = vsyncadd [#allocation9], 4294964736  ;;  %v1257_v0 = vmov 0.0   ;;  %v93_v1 = vld [vmem:[%s1538_s1] sm:$0xff]  ;;  %v889_v2 = vld [vmem:[%s1539_s2 + $0x70] sm:$0xf] }
  0x10   :  { %90 = vst [vmem:[#allocation2] sm:$0xff] %v1257_v0  ;;  %v1066_v3 = vld [vmem:[%s1539_s2 + $0x74] sm:$0xf0]  ;;  %95 = vrot.lane.b32.xlu0 %v93_v1, %s1255_s14  ;;  %v881_v5 = vld [vmem:[%s1539_s2 + $0x60] sm:$0xf]  ;;  %v826_v49 = vld [vmem:[%s1538_s1 + $0x8] sm:$0xff] }
  0x11   :  { %91 = vst [vmem:[#allocation2 + $0x8] sm:$0xff] %v1257_v0  ;;  %v890_v4 = vor.u32 %v1066_v3, %v889_v2  ;;  %v1064_v6 = vld [vmem:[%s1539_s2 + $0x64] sm:$0xf0]  ;;  %v1065_v7 = vld [vmem:[%s1539_s2 + $0x74] sm:$0xf]  ;;  %vm102_vm0 = vcmask 523264  }
  0x12   :  { %92 = vst [vmem:[#allocation2 + $0x10] sm:$0xff] %v1257_v0  ;;  %v891_v8 = vld [vmem:[%s1539_s2 + $0x78] sm:$0xf0]  ;;  %v882_v9 = vor.u32 %v1064_v6, %v881_v5  ;;  %v1063_v11 = vld [vmem:[%s1539_s2 + $0x64] sm:$0xf]  ;;  %vm98_vm1 = vcmask 1048064  }
  0x13   :  { %235 = vmatpush.bf16.msra.mxu0 %v890_v4  ;;  %v894_v10 = vor.u32 %v1065_v7, %v891_v8  ;;  %v873_v12 = vld [vmem:[%s1539_s2 + $0x50] sm:$0xf]  ;;  %v1062_v13 = vld [vmem:[%s1539_s2 + $0x54] sm:$0xf0]  ;;  %v883_v14 = vld [vmem:[%s1539_s2 + $0x68] sm:$0xf0] }
  0x14   :  { %v886_v15 = vor.u32 %v1063_v11, %v883_v14  ;;  %v1061_v16 = vld [vmem:[%s1539_s2 + $0x54] sm:$0xf]  ;;  %v875_v17 = vld [vmem:[%s1539_s2 + $0x58] sm:$0xf0]  ;;  %v874_v18 = vor.u32 %v1062_v13, %v873_v12  ;;  %v865_v19 = vld [vmem:[%s1539_s2 + $0x40] sm:$0xf] }
  0x15   :  { %248 = vmatpush.bf16.msra.mxu1 %v894_v10  ;;  %v1060_v20 = vld [vmem:[%s1539_s2 + $0x44] sm:$0xf0]  ;;  %v878_v21 = vor.u32 %v1061_v16, %v875_v17  ;;  %v857_v23 = vld [vmem:[%s1539_s2 + $0x30] sm:$0xf]  ;;  %v1058_v24 = vld [vmem:[%s1539_s2 + $0x34] sm:$0xf0] }
  0x16   :  { %v866_v22 = vor.u32 %v1060_v20, %v865_v19  ;;  %v858_v25 = vor.u32 %v1058_v24, %v857_v23  ;;  %v849_v26 = vld [vmem:[%s1539_s2 + $0x20] sm:$0xf]  ;;  %v1056_v27 = vld [vmem:[%s1539_s2 + $0x24] sm:$0xf0]  ;;  %v1059_v28 = vld [vmem:[%s1539_s2 + $0x44] sm:$0xf] }
  0x17   :  { %236 = vmatpush.bf16.msra.mxu0 %v882_v9  ;;  %v850_v29 = vor.u32 %v1056_v27, %v849_v26  ;;  %v867_v30 = vld [vmem:[%s1539_s2 + $0x48] sm:$0xf0]  ;;  %v841_v32 = vld [vmem:[%s1539_s2 + $0x10] sm:$0xf]  ;;  %v1054_v33 = vld [vmem:[%s1539_s2 + $0x14] sm:$0xf0] }
  0x18   :  { %v870_v31 = vor.u32 %v1059_v28, %v867_v30  ;;  %v1057_v34 = vld [vmem:[%s1539_s2 + $0x34] sm:$0xf]  ;;  %v842_v35 = vor.u32 %v1054_v33, %v841_v32  ;;  %v859_v36 = vld [vmem:[%s1539_s2 + $0x38] sm:$0xf0]  ;;  %v833_v37 = vld [vmem:[%s1539_s2] sm:$0xf] }
  0x19   :  { %249 = vmatpush.bf16.msra.mxu1 %v886_v15  ;;  %v1052_v38 = vld [vmem:[%s1539_s2 + $0x4] sm:$0xf0]  ;;  %v862_v39 = vor.u32 %v1057_v34, %v859_v36  ;;  %v1055_v40 = vld [vmem:[%s1539_s2 + $0x24] sm:$0xf]  ;;  %v851_v41 = vld [vmem:[%s1539_s2 + $0x28] sm:$0xf0] }
  0x1a   :  { %v834_v42 = vor.u32 %v1052_v38, %v833_v37  ;;  %v854_v43 = vor.u32 %v1055_v40, %v851_v41  ;;  %v1053_v44 = vld [vmem:[%s1539_s2 + $0x14] sm:$0xf]  ;;  %v843_v45 = vld [vmem:[%s1539_s2 + $0x18] sm:$0xf0]  ;;  %v1051_v47 = vld [vmem:[%s1539_s2 + $0x4] sm:$0xf] }
  0x1b   :  { %237 = vmatpush.bf16.msra.mxu0 %v874_v18  ;;  %v846_v46 = vor.u32 %v1053_v44, %v843_v45  ;;  %v835_v48 = vld [vmem:[%s1539_s2 + $0x8] sm:$0xf0]  ;;  %103 = vst.msk [vmem:[#allocation3] sm:$0xff] %vm102_vm0, %v826_v49  ;;  %v128_v52 = vld [vmem:[%s1537_s0] sm:$0xff]  ;;  %vm129_vm2 = vcmask 39936   ;;  %v827_v16 = vld [vmem:[%s1538_s1 + $0x10] sm:$0xff] }
  0x1c   :  { %v838_v50 = vor.u32 %v1051_v47, %v835_v48  ;;  %v149_v56 = vld [vmem:[%s1540_s3] sm:$0x3]  ;;  %v957_v24 = vld [vmem:[#allocation5 + $0x78] sm:$0xf0]  ;;  %v1080_v26 = vld [vmem:[#allocation5 + $0x64] sm:$0xf0] }
  0x1d   :  { %250 = vmatpush.bf16.msra.mxu1 %v878_v21  ;;  %v151_v57 = vperm.slane %v149_v56, 0  ;;  %v152_v2 = vperm.slane %v149_v56, 1  ;;  %v955_v20 = vld [vmem:[#allocation5 + $0x70] sm:$0xf]  ;;  %v1082_v21 = vld [vmem:[#allocation5 + $0x74] sm:$0xf0] }
  0x1e   :  { %v956_v23 = vor.u32 %v1082_v21, %v955_v20  ;;  %v1079_v28 = vld [vmem:[#allocation5 + $0x64] sm:$0xf]  ;;  %v939_v32 = vld [vmem:[#allocation5 + $0x50] sm:$0xf]  ;;  %v1078_v33 = vld [vmem:[#allocation5 + $0x54] sm:$0xf0] }
  0x1f   :  { %238 = vmatpush.bf16.msra.mxu0 %v866_v22  ;;  %v1081_v22 = vld [vmem:[#allocation5 + $0x74] sm:$0xf]  ;;  %v940_v37 = vor.u32 %v1078_v33, %v939_v32  ;;  %v1076_v40 = vld [vmem:[#allocation5 + $0x44] sm:$0xf0]  ;;  %v1075_v41 = vld [vmem:[#allocation5 + $0x44] sm:$0xf] }
  0x20   :  { %v960_v27 = vor.u32 %v1081_v22, %v957_v24  ;;  %432 = vmatpush.bf16.msra.mxu2 %v956_v23  ;;  %v1077_v34 = vld [vmem:[#allocation5 + $0x54] sm:$0xf]  ;;  %v1074_v47 = vld [vmem:[#allocation5 + $0x34] sm:$0xf0]  ;;  %v925_v49 = vld [vmem:[#allocation5 + $0x38] sm:$0xf0] }
  0x21   :  { %251 = vmatpush.bf16.msra.mxu1 %v870_v31  ;;  %v1073_v48 = vld [vmem:[#allocation5 + $0x34] sm:$0xf]  ;;  %v1071_v56 = vld [vmem:[#allocation5 + $0x24] sm:$0xf]  ;;  %s1258_s2 = smov [#allocation11]   ;;  %s811_s22 = sshll.u32 %s1547_s10, 4  ;;  %s812_s22 = int_to_ptr.hbm [resolvable:$true] %s811_s22 }
  0x22   :  { %v300_v51 = vld [vmem:[#allocation3] sm:$0xff]  ;;  %445 = vmatpush.bf16.msra.mxu3 %v960_v27  ;;  %s809_s21 = sshll.u32 %s1258_s2, 4  ;;  %s810_s21 = int_to_ptr.vmem [resolvable:$true] %s809_s21 }
  0x23   :  { %239 = vmatpush.bf16.msra.mxu0 %v858_v25  ;;  %302 = vrot.lane.b32.xlu0 %v300_v51, %s1255_s14  ;;  %v947_v25 = vld [vmem:[#allocation5 + $0x60] sm:$0xf]  ;;  %v828_v21 = vld [vmem:[%s1538_s1 + $0x18] sm:$0xff] }
  0x24   :  { %v948_v30 = vor.u32 %v1080_v26, %v947_v25  ;;  %115 = vst.msk [vmem:[#allocation3 + $0x8] sm:$0xff] %vm102_vm0, %v828_v21  ;;  %v346_v26 = vld [vmem:[%s1542_s5] sm:$0x3]  ;;  %v997_v21 = vld [vmem:[#allocation8 + $0x40] sm:$0xf] }
  0x25   :  { %252 = vmatpush.bf16.msra.mxu1 %v862_v39  ;;  %v931_v39 = vld [vmem:[#allocation5 + $0x40] sm:$0xf]  ;;  %v348_v27 = vperm.slane %v346_v26, 0 }
  0x26   :  { %433 = vmatpush.bf16.msra.mxu2 %v948_v30  ;;  %v932_v44 = vor.u32 %v1076_v40, %v931_v39 }
  0x27   :  { %240 = vmatpush.bf16.msra.mxu0 %v850_v29  ;;  %v949_v29 = vld [vmem:[#allocation5 + $0x68] sm:$0xf0] }
  0x28   :  { %v952_v31 = vor.u32 %v1079_v28, %v949_v29 }
  0x29   :  { %253 = vmatpush.bf16.msra.mxu1 %v854_v43 }
  0x2a   :  { %446 = vmatpush.bf16.msra.mxu3 %v952_v31  ;;  %434 = vmatpush.bf16.msra.mxu2 %v940_v37  ;;  %v830_v31 = vld [vmem:[%s1538_s1 + $0x28] sm:$0xff]  ;;  %v349_v37 = vperm.slane %v346_v26, 1 }
  0x2b   :  { %241 = vmatpush.bf16.msra.mxu0 %v842_v35  ;;  %v941_v35 = vld [vmem:[#allocation5 + $0x58] sm:$0xf0]  ;;  %v498_v22 = vld [vmem:[#allocation3 + $0x8] sm:$0xff]  ;;  %127 = vst.msk [vmem:[#allocation3 + $0x10] sm:$0xff] %vm102_vm0, %v830_v31  ;;  %v1090_v31 = vld [vmem:[#allocation8 + $0x34] sm:$0xf0] }
  0x2c   :  { %v944_v38 = vor.u32 %v1077_v34, %v941_v35 }
  0x2d   :  { %254 = vmatpush.bf16.msra.mxu1 %v846_v46  ;;  %v923_v46 = vld [vmem:[#allocation5 + $0x30] sm:$0xf] }
  0x2e   :  { %447 = vmatpush.bf16.msra.mxu3 %v944_v38  ;;  %435 = vmatpush.bf16.msra.mxu2 %v932_v44  ;;  %v924_v51 = vor.u32 %v1074_v47, %v923_v46 }
  0x2f   :  { %242 = vmatpush.bf16.msra.mxu0 %v834_v42  ;;  %v933_v42 = vld [vmem:[#allocation5 + $0x48] sm:$0xf0] }
  0x30   :  { %v936_v45 = vor.u32 %v1075_v41, %v933_v42 }
  0x31   :  { %255 = vmatpush.bf16.msra.mxu1 %v838_v50 }
  0x32   :  { %448 = vmatpush.bf16.msra.mxu3 %v936_v45  ;;  %436 = vmatpush.bf16.msra.mxu2 %v924_v51  ;;  %v829_v45 = vld [vmem:[%s1538_s1 + $0x20] sm:$0xff] }
  0x82   :  { %v96_v53 = vpop.permute.xlu0 %95 }
  0x83   :  { %99 = vst.msk [vmem:[#allocation2] sm:$0xff] %vm98_vm1, %v96_v53  ;;  %v928_v53 = vor.u32 %v1073_v48, %v925_v49 }
  0x84   :  { %130 = vst.msk [vmem:[#allocation2] sm:$0xff] %vm129_vm2, %v128_v52 }
  0x85   :  { %449 = vmatpush.bf16.msra.mxu3 %v928_v53 }
  0x8b   :  { %v131_v54 = vld [vmem:[#allocation2] sm:$0xff] }
  0x8c   :  { %v132_v55 = vpack.c.bf16 %v131_v54, %v131_v54  ;;  %v915_v54 = vld [vmem:[#allocation5 + $0x20] sm:$0xf] }
  0x8e   :  { %243 = vmatmul.bf16.vlgmr.msra.gmra.mxu0 %v132_v55  ;;  %256 = vmatmul.bf16.vlgmr.msra.gmra.mxu1 %v132_v55  ;;  %v1072_v55 = vld [vmem:[#allocation5 + $0x24] sm:$0xf0] }
  0x95   :  { %v303_v52 = vpop.permute.xlu0 %302 }
 0x10b   :  { %v244_v58 = vpop.f32.mrf.mxu0  ;;  %v257_v59 = vpop.f32.mrf.mxu1 }
 0x10c   :  { %v245_v60 = vadd.f32 %v244_v58, %v151_v57  ;;  %v258_v4 = vadd.f32 %v257_v59, %v152_v2  ;;  %v917_v57 = vld [vmem:[#allocation5 + $0x28] sm:$0xf0] }
 0x10e   :  { %v895_v61 = vmul.f32 -1.442695, %v245_v60  ;;  %v896_v17 = vmul.f32 -1.442695, %v258_v4  ;;  %v916_v60 = vor.u32 %v1072_v55, %v915_v54 }
 0x110   :  { %1112 = vpow2.f32 %v895_v61  ;;  %437 = vmatpush.bf16.msra.mxu2 %v916_v60  ;;  %v1021_v60 = vld [vmem:[#allocation8 + $0x70] sm:$0xf] }
 0x113   :  { %v246_v62 = vpop.f32.mrf.mxu0  ;;  %v259_v63 = vpop.f32.mrf.mxu1 }
 0x114   :  { %v920_v62 = vor.u32 %v1071_v56, %v917_v57 }
 0x116   :  { %v1113_v0 = vpop.eup %1112  ;;  %450 = vmatpush.bf16.msra.mxu3 %v920_v62  ;;  %v1097_v62 = vld [vmem:[#allocation8 + $0x74] sm:$0xf] }
 0x117   :  { %v267_v1 = vadd.f32 1.0, %v1113_v0 }
 0x119   :  { %1114 = vrcp.f32 %v267_v1  ;;  %v280_v7 = vand.u32 2147483648, %v267_v1  ;;  %v278_v9 = vand.u32 2147483647, %v267_v1  ;;  %vm274_vm4 = vweird.f32 %v267_v1 }
 0x11a   :  { %1116 = vtanh.f32 %v258_v4 }
 0x11b   :  { %v281_v12 = vor.u32 1.1754944e-38, %v280_v7  ;;  %vm279_vm6 = vcmp.eq.f32.partialorder %v278_v9, 8.507059e+37  ;;  %1118 = vpow2.f32 %v896_v17  ;;  %v907_v9 = vld [vmem:[#allocation5 + $0x10] sm:$0xf]  ;;  %v1067_v17 = vld [vmem:[#allocation5 + $0x4] sm:$0xf] }
 0x11f   :  { %v1115_v3 = vpop.eup %1114 }
 0x120   :  { %v270_v5 = vmul.f32 %v1115_v3, %v267_v1  ;;  %vm275_vm3 = vweird.f32 %v1115_v3  ;;  %v1117_v11 = vpop.eup %1116 }
 0x121   :  { %vm276_vm5 = vmor %vm274_vm4, %vm275_vm3  ;;  %v1119_v18 = vpop.eup %1118 }
 0x122   :  { %v271_v6 = vsub.f32 1.0, %v270_v5  ;;  %v1447_v19 = vadd.f32 1.0, %v1119_v18  ;;  %v901_v18 = vld [vmem:[#allocation5 + $0x8] sm:$0xf0] }
 0x123   :  { %v904_v20 = vor.u32 %v1067_v17, %v901_v18 }
 0x124   :  { %v272_v8 = vmul.f32 %v1115_v3, %v271_v6  ;;  %1120 = vrcp.f32 %v1447_v19  ;;  %vm289_vm7 = vweird.f32 %v1447_v19  ;;  %v295_v0 = vand.u32 2147483648, %v1447_v19 }
 0x125   :  { %v293_v2 = vand.u32 2147483647, %v1447_v19 }
 0x126   :  { %v273_v10 = vadd.f32 %v1115_v3, %v272_v8 }
 0x127   :  { %vm294_vm10 = vcmp.eq.f32.partialorder %v293_v2, 8.507059e+37  ;;  %v1013_v2 = vld [vmem:[#allocation8 + $0x60] sm:$0xf] }
 0x128   :  { %v277_v13 = vsel %vm276_vm5, %v1115_v3, %v273_v10  ;;  %v296_v3 = vor.u32 1.1754944e-38, %v295_v0  ;;  %v1070_v10 = vld [vmem:[#allocation5 + $0x14] sm:$0xf0] }
 0x129   :  { %v282_v14 = vsel %vm279_vm6, %v281_v12, %v277_v13  ;;  %v908_v12 = vor.u32 %v1070_v10, %v907_v9  ;;  %v909_v13 = vld [vmem:[#allocation5 + $0x18] sm:$0xf0] }
 0x12a   :  { %v306_v15 = vmul.f32 %v1117_v11, %v282_v14  ;;  %v1121_v36 = vpop.eup %1120  ;;  %v305_v59 = vmul.f32 %v303_v52, %v282_v14  ;;  %v1069_v11 = vld [vmem:[#allocation5 + $0x14] sm:$0xf]  ;;  %v899_v14 = vld [vmem:[#allocation5] sm:$0xf] }
 0x12b   :  { %v285_v43 = vmul.f32 %v1121_v36, %v1447_v19  ;;  %vm290_vm8 = vweird.f32 %v1121_v36  ;;  %438 = vmatpush.bf16.msra.mxu2 %v908_v12  ;;  %v694_v52 = vld [vmem:[#allocation3 + $0x10] sm:$0xff] }
 0x12c   :  { %308 = vrot.lane.b32.xlu1 %v306_v15, %s1255_s14  ;;  %vm291_vm9 = vmor %vm289_vm7, %vm290_vm8  ;;  %v1068_v15 = vld [vmem:[#allocation5 + $0x4] sm:$0xf0]  ;;  %v1094_v12 = vld [vmem:[#allocation8 + $0x54] sm:$0xf0] }
 0x12d   :  { %v286_v50 = vsub.f32 1.0, %v285_v43  ;;  %v900_v19 = vor.u32 %v1068_v15, %v899_v14  ;;  %v1093_v14 = vld [vmem:[#allocation8 + $0x54] sm:$0xf]  ;;  %v1007_v15 = vld [vmem:[#allocation8 + $0x58] sm:$0xf0] }
 0x12f   :  { %v287_v58 = vmul.f32 %v1121_v36, %v286_v50  ;;  %439 = vmatpush.bf16.msra.mxu2 %v900_v19 }
 0x131   :  { %v288_v1 = vadd.f32 %v1121_v36, %v287_v58 }
 0x133   :  { %v292_v4 = vsel %vm291_vm9, %v1121_v36, %v288_v1  ;;  %v1023_v1 = vld [vmem:[#allocation8 + $0x78] sm:$0xf0] }
 0x134   :  { %107 = vrot.lane.b32.xlu1 %v827_v16, %s1255_s14  ;;  %v297_v7 = vsel %vm294_vm10, %v296_v3, %v292_v4  ;;  %v912_v16 = vor.u32 %v1069_v11, %v909_v13  ;;  %v1096_v3 = vld [vmem:[#allocation8 + $0x64] sm:$0xf0]  ;;  %v1005_v11 = vld [vmem:[#allocation8 + $0x50] sm:$0xf] }
 0x135   :  { %v1006_v18 = vor.u32 %v1094_v12, %v1005_v11 }
 0x136   :  { %451 = vmatpush.bf16.msra.mxu3 %v912_v16 }
 0x13a   :  { %452 = vmatpush.bf16.msra.mxu3 %v904_v20  ;;  %v1010_v20 = vor.u32 %v1093_v14, %v1007_v15 }
 0x13c   :  { %119 = vrot.lane.b32.xlu1 %v829_v45, %s1255_s14 }
 0x19e   :  { %v309_v61 = vpop.permute.xlu1 %308 }
 0x19f   :  { %v1452_v63 = vadd.f32 %v309_v61, %v305_v59  ;;  %v1098_v61 = vld [vmem:[#allocation8 + $0x74] sm:$0xf0] }
 0x1a0   :  { %v1022_v0 = vor.u32 %v1098_v61, %v1021_v60 }
 0x1a1   :  { %1122 = vtanh.f32 %v1452_v63 }
 0x1a2   :  { %628 = vmatpush.bf16.msrb.mxu0 %v1022_v0 }
 0x1a6   :  { %v108_v5 = vpop.permute.xlu1 %107 }
 0x1a7   :  { %v1123_v6 = vpop.eup %1122  ;;  %111 = vst.msk [vmem:[#allocation2 + $0x8] sm:$0xff] %vm98_vm1, %v108_v5  ;;  %v1095_v5 = vld [vmem:[#allocation8 + $0x64] sm:$0xf] }
 0x1a8   :  { %v313_v8 = vmul.f32 %v1123_v6, %v297_v7  ;;  %v1015_v6 = vld [vmem:[#allocation8 + $0x68] sm:$0xf0]  ;;  %v1014_v7 = vor.u32 %v1096_v3, %v1013_v2 }
 0x1a9   :  { %v1018_v10 = vor.u32 %v1095_v5, %v1015_v6  ;;  %v542_v2 = vld [vmem:[%s1544_s7] sm:$0x3] }
 0x1aa   :  { %323 = vrot.lane.b32.xlu2 %v313_v8, %s1255_s14  ;;  %321 = vst.msk [vmem:[#allocation2] sm:$0xff] %vm98_vm1, %v313_v8  ;;  %629 = vmatpush.bf16.msrb.mxu0 %v1014_v7  ;;  %v544_v3 = vperm.slane %v542_v2, 0  ;;  %v545_v11 = vperm.slane %v542_v2, 1 }
 0x1ae   :  { %v120_v8 = vpop.permute.xlu1 %119  ;;  %630 = vmatpush.bf16.msrb.mxu0 %v1006_v18 }
 0x1af   :  { %123 = vst.msk [vmem:[#allocation2 + $0x10] sm:$0xff] %vm98_vm1, %v120_v8 }
 0x1b1   :  { %v775_v53 = vld [vmem:[#allocation2] sm:$0xff] }
 0x1b2   :  { %500 = vrot.lane.b32.xlu2 %v498_v22, %s1255_s14  ;;  %v1092_v22 = vld [vmem:[#allocation8 + $0x44] sm:$0xf0] }
 0x204   :  { %v324_v23 = vpop.permute.xlu2 %323 }
 0x205   :  { %327 = vst.msk [vmem:[#allocation2 + $0x8] sm:$0xff] %vm102_vm0, %v324_v23 }
 0x20c   :  { %v328_v24 = vld [vmem:[#allocation2 + $0x8] sm:$0xff]  ;;  %v501_v4 = vpop.permute.xlu2 %500 }
 0x20d   :  { %v329_v25 = vpack.c.bf16 %v328_v24, %v328_v24  ;;  %v1091_v24 = vld [vmem:[#allocation8 + $0x44] sm:$0xf] }
 0x20f   :  { %440 = vmatmul.bf16.vlgmr.msra.gmra.mxu2 %v329_v25  ;;  %453 = vmatmul.bf16.vlgmr.msra.gmra.mxu3 %v329_v25  ;;  %v999_v25 = vld [vmem:[#allocation8 + $0x48] sm:$0xf0] }
 0x292   :  { %v441_v28 = vpop.f32.mrf.mxu2  ;;  %v454_v29 = vpop.f32.mrf.mxu3 }
 0x293   :  { %v442_v30 = vadd.f32 %v441_v28, %v348_v27  ;;  %v455_v39 = vadd.f32 %v454_v29, %v349_v37  ;;  %v998_v27 = vor.u32 %v1092_v22, %v997_v21  ;;  %v1002_v29 = vor.u32 %v1091_v24, %v999_v25 }
 0x295   :  { %v961_v32 = vmul.f32 -1.442695, %v442_v30  ;;  %v962_v54 = vmul.f32 -1.442695, %v455_v39  ;;  %v989_v30 = vld [vmem:[#allocation8 + $0x30] sm:$0xf]  ;;  %631 = vmatpush.bf16.msrb.mxu0 %v998_v27 }
 0x297   :  { %1124 = vpow2.f32 %v961_v32 }
 0x29a   :  { %v443_v33 = vpop.f32.mrf.mxu2  ;;  %v456_v34 = vpop.f32.mrf.mxu3 }
 0x29b   :  { %v1089_v33 = vld [vmem:[#allocation8 + $0x34] sm:$0xf]  ;;  %v991_v34 = vld [vmem:[#allocation8 + $0x38] sm:$0xf0] }
 0x29d   :  { %v1125_v35 = vpop.eup %1124 }
 0x29e   :  { %v464_v36 = vadd.f32 1.0, %v1125_v35 }
 0x2a0   :  { %1126 = vrcp.f32 %v464_v36  ;;  %v477_v42 = vand.u32 2147483648, %v464_v36  ;;  %v475_v44 = vand.u32 2147483647, %v464_v36  ;;  %vm471_vm12 = vweird.f32 %v464_v36 }
 0x2a1   :  { %1128 = vtanh.f32 %v455_v39 }
 0x2a2   :  { %v478_v47 = vor.u32 1.1754944e-38, %v477_v42  ;;  %vm476_vm14 = vcmp.eq.f32.partialorder %v475_v44, 8.507059e+37  ;;  %1130 = vpow2.f32 %v962_v54  ;;  %v1088_v42 = vld [vmem:[#allocation8 + $0x24] sm:$0xf0]  ;;  %v983_v44 = vld [vmem:[#allocation8 + $0x28] sm:$0xf0] }
 0x2a3   :  { %v975_v54 = vld [vmem:[#allocation8 + $0x18] sm:$0xf0] }
 0x2a6   :  { %v1127_v38 = vpop.eup %1126 }
 0x2a7   :  { %v467_v40 = vmul.f32 %v1127_v38, %v464_v36  ;;  %vm472_vm11 = vweird.f32 %v1127_v38  ;;  %v1129_v49 = vpop.eup %1128 }
 0x2a8   :  { %vm473_vm13 = vmor %vm471_vm12, %vm472_vm11  ;;  %v1131_v55 = vpop.eup %1130 }
 0x2a9   :  { %v468_v41 = vsub.f32 1.0, %v467_v40  ;;  %v465_v56 = vadd.f32 1.0, %v1131_v55  ;;  %v994_v40 = vor.u32 %v1089_v33, %v991_v34  ;;  %v965_v55 = vld [vmem:[#allocation8] sm:$0xf]  ;;  %v1102_v33 = vld [vmem:[#allocation10 + $0x18] sm:$0xff] }
 0x2aa   :  { %762 = vmatpush.bf16.msrb.mxu2 %v1102_v33 }
 0x2ab   :  { %v469_v43 = vmul.f32 %v1127_v38, %v468_v41  ;;  %1132 = vrcp.f32 %v465_v56  ;;  %v492_v23 = vand.u32 2147483648, %v465_v56  ;;  %vm486_vm2 = vweird.f32 %v465_v56  ;;  %v981_v41 = vld [vmem:[#allocation8 + $0x20] sm:$0xf] }
 0x2ac   :  { %v490_v26 = vand.u32 2147483647, %v465_v56  ;;  %v982_v45 = vor.u32 %v1088_v42, %v981_v41 }
 0x2ad   :  { %v470_v46 = vadd.f32 %v1127_v38, %v469_v43  ;;  %v493_v32 = vor.u32 1.1754944e-38, %v492_v23  ;;  %v1087_v43 = vld [vmem:[#allocation8 + $0x24] sm:$0xf] }
 0x2ae   :  { %vm491_vm4 = vcmp.eq.f32.partialorder %v490_v26, 8.507059e+37 }
 0x2af   :  { %v474_v48 = vsel %vm473_vm13, %v1127_v38, %v470_v46  ;;  %v990_v38 = vor.u32 %v1090_v31, %v989_v30  ;;  %v986_v46 = vor.u32 %v1087_v43, %v983_v44 }
 0x2b0   :  { %v479_v50 = vsel %vm476_vm14, %v478_v47, %v474_v48 }
 0x2b1   :  { %v504_v51 = vmul.f32 %v1129_v49, %v479_v50  ;;  %v1133_v57 = vpop.eup %1132  ;;  %v503_v13 = vmul.f32 %v501_v4, %v479_v50  ;;  %632 = vmatpush.bf16.msrb.mxu0 %v990_v38  ;;  %v973_v50 = vld [vmem:[#allocation8 + $0x10] sm:$0xf] }
 0x2b2   :  { %v482_v58 = vmul.f32 %v1133_v57, %v465_v56  ;;  %vm487_vm15 = vweird.f32 %v1133_v57  ;;  %v1084_v56 = vld [vmem:[#allocation8 + $0x4] sm:$0xf0] }
 0x2b3   :  { %506 = vrot.lane.b32.xlu0 %v504_v51, %s1255_s14  ;;  %vm488_vm3 = vmor %vm486_vm2, %vm487_vm15  ;;  %v1086_v51 = vld [vmem:[#allocation8 + $0x14] sm:$0xf0]  ;;  %v966_v60 = vor.u32 %v1084_v56, %v965_v55 }
 0x2b4   :  { %v483_v59 = vsub.f32 1.0, %v482_v58  ;;  %v1083_v58 = vld [vmem:[#allocation8 + $0x4] sm:$0xf] }
 0x2b5   :  { %633 = vmatpush.bf16.msrb.mxu0 %v982_v45 }
 0x2b6   :  { %v484_v9 = vmul.f32 %v1133_v57, %v483_v59  ;;  %v967_v59 = vld [vmem:[#allocation8 + $0x8] sm:$0xf0] }
 0x2b7   :  { %v970_v61 = vor.u32 %v1083_v58, %v967_v59  ;;  %v730_v58 = vld [vmem:[%s1546_s9] sm:$0x1] }
 0x2b8   :  { %v485_v19 = vadd.f32 %v1133_v57, %v484_v9 }
 0x2ba   :  { %v489_v28 = vsel %vm488_vm3, %v1133_v57, %v485_v19 }
 0x2bb   :  { %696 = vrot.lane.b32.xlu0 %v694_v52, %s1255_s14  ;;  %v494_v37 = vsel %vm491_vm4, %v493_v32, %v489_v28  ;;  %v1085_v52 = vld [vmem:[#allocation8 + $0x14] sm:$0xf] }
 0x2bc   :  { %v978_v57 = vor.u32 %v1085_v52, %v975_v54 }
 0x2c3   :  { %315 = vrot.lane.b32.xlu0 %v1452_v63, %s1255_s14  ;;  %v1026_v63 = vor.u32 %v1097_v62, %v1023_v1 }
 0x2c5   :  { %641 = vmatpush.bf16.msrb.mxu1 %v1026_v63 }
 0x2c9   :  { %642 = vmatpush.bf16.msrb.mxu1 %v1018_v10 }
 0x2cb   :  { %777 = vrot.lane.b32.xlu0 %v775_v53, %s1255_s14  ;;  %v974_v53 = vor.u32 %v1086_v51, %v973_v50  ;;  %v1100_v50 = vld [vmem:[#allocation10 + $0x8] sm:$0xff]  ;;  %v1099_v51 = vld [vmem:[#allocation10] sm:$0xff] }
 0x2cd   :  { %643 = vmatpush.bf16.msrb.mxu1 %v1010_v20  ;;  %634 = vmatpush.bf16.msrb.mxu0 %v974_v53 }
 0x2d1   :  { %644 = vmatpush.bf16.msrb.mxu1 %v1002_v29  ;;  %635 = vmatpush.bf16.msrb.mxu0 %v966_v60 }
 0x2d5   :  { %645 = vmatpush.bf16.msrb.mxu1 %v994_v40 }
 0x2d9   :  { %646 = vmatpush.bf16.msrb.mxu1 %v986_v46 }
 0x2dd   :  { %647 = vmatpush.bf16.msrb.mxu1 %v978_v57 }
 0x2e1   :  { %648 = vmatpush.bf16.msrb.mxu1 %v970_v61 }
 0x325   :  { %v507_v16 = vpop.permute.xlu0 %506 }
 0x326   :  { %v1483_v17 = vadd.f32 %v507_v16, %v503_v13 }
 0x328   :  { %1134 = vtanh.f32 %v1483_v17 }
 0x32d   :  { %v1486_v35 = vpop.permute.xlu0 %696 }
 0x32e   :  { %v1135_v36 = vpop.eup %1134 }
 0x32f   :  { %v511_v39 = vmul.f32 %v1135_v36, %v494_v37  ;;  %v1101_v36 = vld [vmem:[#allocation10 + $0x10] sm:$0xff] }
 0x330   :  { %763 = vmatpush.bf16.msrb.mxu2 %v1101_v36 }
 0x331   :  { %519 = vrot.lane.b32.xlu2 %v511_v39, %s1255_s14  ;;  %517 = vst.msk [vmem:[#allocation2 + $0x8] sm:$0xff] %vm98_vm1, %v511_v39 }
 0x334   :  { %764 = vmatpush.bf16.msrb.mxu2 %v1100_v50 }
 0x335   :  { %v316_v47 = vpop.permute.xlu0 %315 }
 0x336   :  { %319 = vst.msk [vmem:[#allocation3] sm:$0xff] %vm102_vm0, %v316_v47 }
 0x338   :  { %v784_v26 = vld [vmem:[#allocation2 + $0x8] sm:$0xff]  ;;  %765 = vmatpush.bf16.msrb.mxu2 %v1099_v51 }
 0x33d   :  { %v781_v48 = vld [vmem:[#allocation3] sm:$0xff]  ;;  %v778_v49 = vpop.permute.xlu0 %777 }
 0x33e   :  { %1046 = vst.msk [vmem:[%s1548_s11 + $0x8] sm:$0xff] %vm102_vm0, %v781_v48 }
 0x33f   :  { %780 = vst.msk [vmem:[%s1548_s11] sm:$0xff] %vm102_vm0, %v778_v49 }
 0x38b   :  { %v520_v62 = vpop.permute.xlu2 %519 }
 0x38c   :  { %523 = vst.msk [vmem:[#allocation2 + $0x10] sm:$0xff] %vm102_vm0, %v520_v62 }
 0x393   :  { %v524_v0 = vld [vmem:[#allocation2 + $0x10] sm:$0xff] }
 0x394   :  { %v525_v1 = vpack.c.bf16 %v524_v0, %v524_v0 }
 0x396   :  { %636 = vmatmul.bf16.vlgmr.msrb.gmra.mxu0 %v525_v1  ;;  %649 = vmatmul.bf16.vlgmr.msrb.gmra.mxu1 %v525_v1 }
 0x413   :  { %v637_v4 = vpop.f32.mrf.mxu0  ;;  %v650_v63 = vpop.f32.mrf.mxu1 }
 0x414   :  { %v638_v5 = vadd.f32 %v637_v4, %v544_v3  ;;  %v651_v13 = vadd.f32 %v650_v63, %v545_v11 }
 0x416   :  { %v1027_v6 = vmul.f32 -1.442695, %v638_v5  ;;  %v1028_v27 = vmul.f32 -1.442695, %v651_v13 }
 0x418   :  { %1136 = vpow2.f32 %v1027_v6 }
 0x41b   :  { %v639_v7 = vpop.f32.mrf.mxu0  ;;  %v652_v8 = vpop.f32.mrf.mxu1 }
 0x41e   :  { %v1137_v9 = vpop.eup %1136 }
 0x41f   :  { %v660_v10 = vadd.f32 1.0, %v1137_v9 }
 0x421   :  { %1138 = vrcp.f32 %v660_v10  ;;  %v673_v16 = vand.u32 2147483648, %v660_v10  ;;  %v671_v19 = vand.u32 2147483647, %v660_v10  ;;  %vm667_vm6 = vweird.f32 %v660_v10 }
 0x422   :  { %1140 = vtanh.f32 %v651_v13 }
 0x423   :  { %v674_v21 = vor.u32 1.1754944e-38, %v673_v16  ;;  %vm672_vm8 = vcmp.eq.f32.partialorder %v671_v19, 8.507059e+37  ;;  %1142 = vpow2.f32 %v1028_v27 }
 0x427   :  { %v1139_v12 = vpop.eup %1138 }
 0x428   :  { %v663_v14 = vmul.f32 %v1139_v12, %v660_v10  ;;  %vm668_vm5 = vweird.f32 %v1139_v12  ;;  %v1141_v23 = vpop.eup %1140 }
 0x429   :  { %vm669_vm7 = vmor %vm667_vm6, %vm668_vm5  ;;  %v1143_v28 = vpop.eup %1142 }
 0x42a   :  { %v664_v15 = vsub.f32 1.0, %v663_v14  ;;  %v661_v29 = vadd.f32 1.0, %v1143_v28 }
 0x42c   :  { %v665_v18 = vmul.f32 %v1139_v12, %v664_v15  ;;  %1144 = vrcp.f32 %v661_v29  ;;  %v688_v40 = vand.u32 2147483648, %v661_v29  ;;  %vm682_vm10 = vweird.f32 %v661_v29 }
 0x42d   :  { %v686_v41 = vand.u32 2147483647, %v661_v29 }
 0x42e   :  { %v666_v20 = vadd.f32 %v1139_v12, %v665_v18  ;;  %v689_v43 = vor.u32 1.1754944e-38, %v688_v40 }
 0x42f   :  { %vm687_vm12 = vcmp.eq.f32.partialorder %v686_v41, 8.507059e+37 }
 0x430   :  { %v670_v22 = vsel %vm669_vm7, %v1139_v12, %v666_v20 }
 0x431   :  { %v675_v24 = vsel %vm672_vm8, %v674_v21, %v670_v22 }
 0x432   :  { %v700_v25 = vmul.f32 %v1141_v23, %v675_v24  ;;  %v1145_v30 = vpop.eup %1144  ;;  %v699_v37 = vmul.f32 %v1486_v35, %v675_v24 }
 0x433   :  { %v678_v31 = vmul.f32 %v1145_v30, %v661_v29  ;;  %vm683_vm9 = vweird.f32 %v1145_v30 }
 0x434   :  { %702 = vrot.lane.b32.xlu1 %v700_v25, %s1255_s14  ;;  %vm684_vm11 = vmor %vm682_vm10, %vm683_vm9 }
 0x435   :  { %v679_v32 = vsub.f32 1.0, %v678_v31 }
 0x437   :  { %v680_v34 = vmul.f32 %v1145_v30, %v679_v32 }
 0x43c   :  { %513 = vrot.lane.b32.xlu1 %v1483_v17, %s1255_s14  ;;  %v681_v17 = vadd.f32 %v1145_v30, %v680_v34 }
 0x43e   :  { %v685_v42 = vsel %vm684_vm11, %v1145_v30, %v681_v17 }
 0x43f   :  { %v690_v46 = vsel %vm687_vm12, %v689_v43, %v685_v42 }
 0x444   :  { %786 = vrot.lane.b32.xlu1 %v784_v26, %s1255_s14 }
 0x4a6   :  { %v703_v38 = vpop.permute.xlu1 %702 }
 0x4a7   :  { %v705_v39 = vadd.f32 %v703_v38, %v699_v37 }
 0x4a9   :  { %1146 = vtanh.f32 %v705_v39 }
 0x4ae   :  { %v514_v44 = vpop.permute.xlu1 %513 }
 0x4af   :  { %v1147_v45 = vpop.eup %1146  ;;  %516 = vst.msk [vmem:[#allocation3 + $0x8] sm:$0xff] %vm102_vm0, %v514_v44 }
 0x4b0   :  { %v707_v47 = vmul.f32 %v1147_v45, %v690_v46 }
 0x4b2   :  { %715 = vrot.lane.b32.xlu2 %v707_v47, %s1255_s14  ;;  %713 = vst.msk [vmem:[#allocation2 + $0x10] sm:$0xff] %vm98_vm1, %v707_v47  ;;  %vm718_vm1 = vcmask 523271  }
 0x4b6   :  { %v791_v35 = vld [vmem:[#allocation3 + $0x8] sm:$0xff]  ;;  %v787_v48 = vpop.permute.xlu1 %786 }
 0x4b7   :  { %1048 = vst.msk [vmem:[%s1548_s11 + $0x18] sm:$0xff] %vm102_vm0, %v791_v35 }
 0x4b8   :  { %1047 = vst.msk [vmem:[%s1548_s11 + $0x10] sm:$0xff] %vm102_vm0, %v787_v48 }
 0x4b9   :  { %v794_v49 = vld [vmem:[#allocation2 + $0x10] sm:$0xff] }
 0x4ba   :  { %709 = vrot.lane.b32.xlu2 %v705_v39, %s1255_s14 }
 0x4c2   :  { %796 = vrot.lane.b32.xlu2 %v794_v49, %s1255_s14 }
 0x50c   :  { %v716_v52 = vpop.permute.xlu2 %715 }
 0x50d   :  { %719 = vst.msk [vmem:[#allocation4 - $0x7] sm:$0x80] %vm718_vm1, %v716_v52 }
 0x514   :  { %v710_v53 = vpop.permute.xlu2 %709  ;;  %v720_v54 = vld [vmem:[#allocation4] sm:$0x1] }
 0x515   :  { %712 = vst.msk [vmem:[#allocation3 + $0x10] sm:$0xff] %vm102_vm0, %v710_v53  ;;  %v721_v55 = vpack.c.bf16 %v720_v54, %v720_v54 }
 0x517   :  { %1045 = vmatmul.msk.bf16.vlgmr.msrb.gmra.mxu2 %vm102_vm0, %v721_v55 }
 0x51c   :  { %v801_v56 = vld [vmem:[#allocation3 + $0x10] sm:$0xff]  ;;  %v797_v57 = vpop.permute.xlu2 %796 }
 0x51d   :  { %1050 = vst.msk [vmem:[%s1548_s11 + $0x28] sm:$0xff] %vm102_vm0, %v801_v56 }
 0x51e   :  { %1049 = vst.msk [vmem:[%s1548_s11 + $0x20] sm:$0xff] %vm102_vm0, %v797_v57 }
 0x59a   :  { %v767_v59 = vpop.f32.mrf.mxu2 }
 0x59b   :  { %v768_v60 = vadd.f32 %v767_v59, %v730_v58 }
 0x59d   :  { %771 = vst [vmem:[#allocation11] sm:$0x1] %v768_v60 }
 0x59e   :  { %814 = dma.vmem_to_hbm [thread:$0]  %s810_s21, 16, %s812_s22, [#allocation7]  }
 0x5a2   :  { %v769_v61 = vpop.f32.mrf.mxu2 }
 0x5a3   :  { %1248 = dma.done.wait [#allocation7], 16  }
 0x5a4   :  { %1249 = vsyncadd [#allocation7], 4294967280 }
 0x5a5   :  { %823 = vsyncpa [#allocation6], 1 }
 0x5a6   :  { %824 = vsyncpa [#allocation9], 1 }
 0x5a7   :  { %825 = vsyncpa [#allocation7], 1 }

</bundles_post_ra>
